<compile_context>
chip_gen: v5e
topology: v5e:2x2
jax: 0.10.0
libtpu: 0.0.40
codegen_flags: <defaults>
</compile_context>

<pallas_src>
import functools

import jax
import jax.numpy as jnp
from jax import lax
from jax.experimental import pallas as pl
from jax.experimental.pallas import tpu as pltpu

LN_EPS = 1e-5            # torch nn.LayerNorm default eps
BCE_LOG_CLAMP = -100.0   # torch nn.BCELoss clamps log() at -100


def _bce_elem(p, t):
    """Element-wise binary cross entropy with torch-style log clamping."""
    log_p = jnp.maximum(jnp.log(p), BCE_LOG_CLAMP)
    log_1p = jnp.maximum(jnp.log(1.0 - p), BCE_LOG_CLAMP)
    return -(t * log_p + (1.0 - t) * log_1p)


def _bce_logits_elem(x, t):
    """BCE(sigmoid(x), t) in logits/softplus form: 2 transcendentals, no clamps."""
    return jnp.maximum(x, 0.0) - t * x + jnp.log(1.0 + jnp.exp(-jnp.abs(x)))


def _smooth_l1_elem(a, b):
    """Element-wise SmoothL1 (torch default beta=1.0)."""
    d = jnp.abs(a - b)
    return jnp.where(d < 1.0, 0.5 * d * d, d - 0.5)


def _decoder_train_kernel(
    x_ref,      # [B*T, D]   fea, permuted (0,2,1) + flattened in the wrapper
    pdn_ref,    # [10, D]    LN gammas/betas + Linear1 biases (packed)
    w1_ref,     # [2, D, D]  Linear1 weights (0: reg head, 1: cls head)
    w2_ref,     # [D+1, 3W]  Linear2 weights + bias row D; reg cols planar [x | y]
    slab_ref,   # [6, B*T, W] score / mask / prop_x / prop_y / gt_x / gt_y planes
    thr_ref,    # SMEM [1]   score.max() * thres_adjmat (hoisted to the wrapper)
    *rest,      # optional (w_all_ref [B, NW*T*W], nm_ref [B, NW*T*W]), then out_ref [1,128]
    batch, seq, n_win, dim, loss_weight, with_weight_loss, use_bf16_matmul,
):
    if with_weight_loss:
        w_all_ref, nm_ref, out_ref = rest
    else:
        (out_ref,) = rest

    W, D = n_win, dim

    def mm(a, b):
        if use_bf16_matmul:        # v6e / v7x: bf16-native MXU, keep f32 accumulate
            a = a.astype(jnp.bfloat16)
            b = b.astype(jnp.bfloat16)
        return jnp.dot(a, b, preferred_element_type=jnp.float32)

    # Shared LayerNorm statistics (both heads start with LayerNorm(fea)).
    x = x_ref[...]
    if x.dtype != jnp.float32:
        x = x.astype(jnp.float32)
    mu = jnp.mean(x, axis=-1, keepdims=True)
    xc = x - mu
    var = jnp.mean(xc * xc, axis=-1, keepdims=True)
    xn = xc * lax.rsqrt(var + LN_EPS)                                   # [B*T, D]

    w2_all = w2_ref[...]
    w2_mat = w2_all[:D, :]
    b2_row = w2_all[D:D + 1, :]

    def head(g1, bt1, w1, b1, g2, bt2, w2, b2):
        h = xn * g1 + bt1                                               # LayerNorm affine
        h = mm(h, w1) + b1                                              # Linear(D, D)
        m2 = jnp.mean(h, axis=-1, keepdims=True)
        hc = h - m2
        v2 = jnp.mean(hc * hc, axis=-1, keepdims=True)
        h = hc * lax.rsqrt(v2 + LN_EPS) * g2 + bt2                      # LayerNorm(D)
        h = jnp.maximum(h, 0.0)                                         # ReLU
        # TODO(synk): nn.Dropout treated as identity; add pltpu.prng_*-based dropout
        # for train-time stochasticity if config['dropout'] > 0.
        return mm(h, w2) + b2                                           # Linear(D, out)

    out_r = head(pdn_ref[0:1, :], pdn_ref[1:2, :], w1_ref[0], pdn_ref[8:9, :],
                 pdn_ref[2:3, :], pdn_ref[3:4, :],
                 w2_mat[:, :2 * W], b2_row[:, :2 * W])                  # [B*T, 2W] = [x | y]
    out_c = head(pdn_ref[4:5, :], pdn_ref[5:6, :], w1_ref[1], pdn_ref[9:10, :],
                 pdn_ref[6:7, :], pdn_ref[7:8, :],
                 w2_mat[:, 2 * W:], b2_row[:, 2 * W:])                  # [B*T, W]

    s = slab_ref[0]           # score            [B*T, W]
    msk = slab_ref[1]         # score_mask
    px = slab_ref[2]          # proposals x
    py = slab_ref[3]          # proposals y
    gt_x = slab_ref[4]        # gt_reg[:, 0] broadcast over (T, W)
    gt_y = slab_ref[5]        # gt_reg[:, 1] broadcast over (T, W)

    # cls loss: sigmoid -> mask -> BCE with torch-style log clamp.  (Kept in this exact
    # form: masked elements contribute 100*score via the clamp, a logits-BCE would not.)
    pred_score = jax.nn.sigmoid(out_c) * msk
    cls_sum = jnp.sum(_bce_elem(pred_score, s))

    # reg loss: SmoothL1(refine_box * score_pos, gt * score_pos); threshold from SMEM.
    thr = thr_ref[0]
    s_pos = jnp.where(s >= thr, s, 0.0)
    ref_x = (px + out_r[:, :W]) * s_pos
    ref_y = (py + out_r[:, W:2 * W]) * s_pos
    reg_sum = (jnp.sum(_smooth_l1_elem(ref_x, gt_x * s_pos))
               + jnp.sum(_smooth_l1_elem(ref_y, gt_y * s_pos)))

    # weight loss: one lane-dense logits-BCE pass over all attention weights at once.
    if with_weight_loss:
        w_sum = jnp.sum(_bce_logits_elem(w_all_ref[...], nm_ref[...]))
    else:
        w_sum = jnp.zeros((), jnp.float32)

    n_cls = float(batch * seq * n_win)
    reg_mean = reg_sum / (2.0 * n_cls)
    cls_mean = cls_sum / n_cls
    w_mean = w_sum / n_cls
    total = (loss_weight[0] * cls_mean + loss_weight[1] * reg_mean
             + loss_weight[2] * w_mean)

    lane = lax.broadcasted_iota(jnp.int32, (1, 128), 1)
    out_ref[...] = (jnp.where(lane == 0, total, 0.0)
                    + jnp.where(lane == 1, reg_mean, 0.0)
                    + jnp.where(lane == 2, cls_mean, 0.0)
                    + jnp.where(lane == 3, w_mean, 0.0))


def pack_params(params, D, W):
    """Pack the 16 tiny head parameters into 3 slabs (done once, host side)."""
    reg, cls = params['reg'], params['cls']
    pdn = jnp.stack([reg['ln1_g'], reg['ln1_b'], reg['ln2_g'], reg['ln2_b'],
                     cls['ln1_g'], cls['ln1_b'], cls['ln2_g'], cls['ln2_b'],
                     reg['b1'], cls['b1']], axis=0).astype(jnp.float32)          # [10, D]
    w1p = jnp.stack([reg['w1'], cls['w1']], axis=0).astype(jnp.float32)          # [2, D, D]
    # reg W2 columns are interleaved (x0,y0,x1,y1,...); re-pack planar [x0..x_{W-1}, y0..]
    reg_w2_pl = reg['w2'].reshape(D, W, 2).transpose(0, 2, 1).reshape(D, 2 * W)
    reg_b2_pl = reg['b2'].reshape(W, 2).T.reshape(2 * W)
    w2_mat = jnp.concatenate([reg_w2_pl, cls['w2']], axis=1)                     # [D, 3W]
    b2_row = jnp.concatenate([reg_b2_pl, cls['b2']])[None, :]                    # [1, 3W]
    w2p = jnp.concatenate([w2_mat, b2_row], axis=0).astype(jnp.float32)          # [D+1, 3W]
    return pdn, w1p, w2p


def anchor_decoder_train(fea, weights, score, gt_reg, score_mask, score_nm,
                         proposals, packed_params, config, *, use_bf16_matmul=False):
    """Train-mode forward of AnchorBasedDecoder.

    fea                           : [B, D, T]  (channels-first, as the module receives it)
    weights                       : tuple of [B, T, W] attention-weight logits
    score / score_mask / score_nm : [B, T, W]
    gt_reg                        : [B, 2]
    proposals                     : [B, T, W, 2]
    Returns (None, {'reg_loss','cls_loss','weight_loss','loss'}) like the torch module.
    """
    B, D, T = fea.shape
    W = len(config['window_width'])
    NW = len(weights)
    with_weight_loss = bool(config['with_weight_loss'])
    pdn, w1p, w2p = packed_params
    bt = B * T

    # ---- one-time XLA-side layout glue (not a per-step cost) ----
    x = jnp.transpose(fea, (0, 2, 1)).reshape(bt, D).astype(jnp.float32)

    gt_x = jnp.broadcast_to(gt_reg[:, 0:1, None].astype(jnp.float32), (B, T, W)).reshape(bt, W)
    gt_y = jnp.broadcast_to(gt_reg[:, 1:2, None].astype(jnp.float32), (B, T, W)).reshape(bt, W)
    slab = jnp.stack([
        score.reshape(bt, W).astype(jnp.float32),
        score_mask.reshape(bt, W).astype(jnp.float32),
        proposals[..., 0].reshape(bt, W).astype(jnp.float32),
        proposals[..., 1].reshape(bt, W).astype(jnp.float32),
        gt_x, gt_y], axis=0)                                            # [6, B*T, W]

    # Global score max hoisted out of the kernel -> one SMEM scalar.
    thr = (jnp.max(score).astype(jnp.float32)
           * jnp.float32(config['thres_adjmat'])).reshape(1)

    vmem = pl.BlockSpec(memory_space=pltpu.MemorySpace.VMEM)
    smem = pl.BlockSpec(memory_space=pltpu.MemorySpace.SMEM)

    args = [x, pdn, w1p, w2p, slab, thr]
    in_specs = [vmem, vmem, vmem, vmem, vmem, smem]

    if with_weight_loss:
        # Lane-dense flattened weight logits [B, NW*T*W]; score_nm tiled to match.
        w_all = jnp.stack(weights, axis=1).reshape(B, NW * T * W).astype(jnp.float32)
        nm_rep = jnp.tile(score_nm.reshape(B, T * W).astype(jnp.float32), (1, NW))
        args += [w_all, nm_rep]
        in_specs += [vmem, vmem]

    kernel = functools.partial(
        _decoder_train_kernel,
        batch=B, seq=T, n_win=W, dim=D,
        loss_weight=tuple(float(v) for v in config['loss_weight']),
        with_weight_loss=with_weight_loss,
        use_bf16_matmul=use_bf16_matmul,
    )

    flops = 2 * (2 * bt * D * D) + 2 * bt * D * (3 * W)
    transcendentals = bt * W * 4 + (2 * B * NW * T * W if with_weight_loss else 0)
    bytes_accessed = sum(int(a.size) * a.dtype.itemsize for a in args) + 128 * 4
    vmem_limit = int(min(64 << 20, max(4 << 20, 4 * bytes_accessed)))

    out = pl.pallas_call(
        kernel,
        out_shape=jax.ShapeDtypeStruct((1, 128), jnp.float32),
        in_specs=in_specs,
        out_specs=vmem,
        compiler_params=pltpu.CompilerParams(vmem_limit_bytes=vmem_limit),
        cost_estimate=pl.CostEstimate(flops=flops,
                                      transcendentals=transcendentals,
                                      bytes_accessed=bytes_accessed),
    )(*args)

    # TODO(synk): for production-sized B*T on v7x, split rows across the two TensorCores
    # with a leading size-2 "parallel" grid axis and sum the per-core partials.
    losses = {'reg_loss': out[0, 1], 'cls_loss': out[0, 2],
              'weight_loss': out[0, 3], 'loss': out[0, 0]}
    # TODO(synk): 'val' / 'test' modes (topk-1 + gather of the best proposal) are plain-JAX
    # glue and are not kernelized here; adj_mat is unused by the reference forward.
    return None, losses


# ------------------------------ plain-JAX reference ------------------------------
def reference_forward(fea, weights, score, gt_reg, score_mask, score_nm,
                      proposals, params, config):
    B, D, T = fea.shape
    W = len(config['window_width'])
    x = jnp.transpose(fea, (0, 2, 1))                    # [B, T, D]

    def layer_norm(v, g, bias):
        m = jnp.mean(v, axis=-1, keepdims=True)
        var = jnp.mean((v - m) ** 2, axis=-1, keepdims=True)
        return (v - m) * lax.rsqrt(var + LN_EPS) * g + bias

    def run_head(p):
        h = layer_norm(x, p['ln1_g'], p['ln1_b'])
        h = h @ p['w1'] + p['b1']
        h = layer_norm(h, p['ln2_g'], p['ln2_b'])
        h = jnp.maximum(h, 0.0)
        return h @ p['w2'] + p['b2']

    offset = run_head(params['reg']).reshape(B, T * W, 2)
    cls_out = run_head(params['cls'])
    pred_score = jax.nn.sigmoid(cls_out).reshape(B, T * W) * score_mask.reshape(B, T * W)

    refine = proposals.reshape(B, T * W, 2) + offset
    score_f = score.reshape(B, T * W)
    thr = jnp.max(score_f) * config['thres_adjmat']
    s_pos = jnp.where(score_f >= thr, score_f, 0.0)[..., None]
    gt = jnp.broadcast_to(gt_reg[:, None, :], refine.shape)
    loss_reg = jnp.mean(_smooth_l1_elem(refine * s_pos, gt * s_pos))
    loss_cls = jnp.mean(_bce_elem(pred_score, score_f))
    loss_w = jnp.float32(0.0)
    if config['with_weight_loss']:
        for w in weights:
            loss_w = loss_w + jnp.mean(
                _bce_elem(jax.nn.sigmoid(w).reshape(B, -1), score_nm.reshape(B, -1)))
    lw = config['loss_weight']
    loss = lw[0] * loss_cls + lw[1] * loss_reg + lw[2] * loss_w
    return loss, loss_reg, loss_cls, loss_w


def init_params(key, D, W):
    def head_params(k, out_dim):
        ks = jax.random.split(k, 8)
        bound = D ** -0.5
        return {
            'ln1_g': 1.0 + 0.1 * jax.random.normal(ks[0], (D,), jnp.float32),
            'ln1_b': 0.1 * jax.random.normal(ks[1], (D,), jnp.float32),
            'ln2_g': 1.0 + 0.1 * jax.random.normal(ks[2], (D,), jnp.float32),
            'ln2_b': 0.1 * jax.random.normal(ks[3], (D,), jnp.float32),
            'w1': jax.random.uniform(ks[4], (D, D), jnp.float32, -bound, bound),
            'b1': jax.random.uniform(ks[5], (D,), jnp.float32, -bound, bound),
            'w2': jax.random.uniform(ks[6], (D, out_dim), jnp.float32, -bound, bound),
            'b2': jax.random.uniform(ks[7], (out_dim,), jnp.float32, -bound, bound),
        }
    k_reg, k_cls = jax.random.split(key)
    return {'reg': head_params(k_reg, 2 * W), 'cls': head_params(k_cls, W)}


if __name__ == "__main__":
    jax.config.update("jax_default_matmul_precision", "highest")

    config = {
        'attention_dim': 32,
        'window_width': [8, 16, 32, 64],     # W = 4 anchor widths per time step
        'dropout': 0.0,                       # dropout treated as identity in the kernel
        'thres_adjmat': 0.5,
        'loss_weight': [1.0, 5.0, 1.0],
        'with_weight_loss': True,
    }
    B, T = 2, 16
    D = config['attention_dim']
    W = len(config['window_width'])
    NW = 2

    key = jax.random.PRNGKey(0)
    ks = jax.random.split(key, 10)
    fea = jax.random.normal(ks[0], (B, D, T), jnp.float32)
    score_mask = (jax.random.uniform(ks[1], (B, T, W)) > 0.3).astype(jnp.float32)
    score = jax.random.uniform(ks[2], (B, T, W), jnp.float32) * score_mask
    score_nm = jax.random.uniform(ks[3], (B, T, W), jnp.float32)
    gt_reg = jax.random.uniform(ks[4], (B, 2), jnp.float32)
    proposals = jax.random.uniform(ks[5], (B, T, W, 2), jnp.float32)
    weights = tuple(jax.random.normal(ks[6 + i], (B, T, W), jnp.float32)
                    for i in range(NW))
    params = init_params(ks[8], D, W)
    packed = pack_params(params, D, W)

    # bf16 MXU operands are a v6e/v7x knob; keep f32 here so the 1e-3 check is exact.
    _, losses = anchor_decoder_train(fea, weights, score, gt_reg, score_mask,
                                     score_nm, proposals, packed, config,
                                     use_bf16_matmul=False)
    losses = jax.block_until_ready(losses)

    ref_loss, ref_reg, ref_cls, ref_w = reference_forward(
        fea, weights, score, gt_reg, score_mask, score_nm, proposals, params, config)

    checks = [
        (losses['loss'], ref_loss),
        (losses['reg_loss'], ref_reg),
        (losses['cls_loss'], ref_cls),
        (losses['weight_loss'], ref_w),
    ]
    for got, want in checks:
        assert jnp.allclose(got, want, atol=1e-3, rtol=1e-3), (got, want)

    print("KERNEL_OK")
</pallas_src>

<mosaic_0001>
module attributes {stable_mosaic.version = 11 : i64} {
  func.func @_decoder_train_kernel(%arg0: memref<32x32xf32, #tpu.memory_space<vmem>>, %arg1: memref<10x32xf32, #tpu.memory_space<vmem>>, %arg2: memref<2x32x32xf32, #tpu.memory_space<vmem>>, %arg3: memref<33x12xf32, #tpu.memory_space<vmem>>, %arg4: memref<6x32x4xf32, #tpu.memory_space<vmem>>, %arg5: memref<1xf32, #tpu.memory_space<smem>>, %arg6: memref<2x128xf32, #tpu.memory_space<vmem>>, %arg7: memref<2x128xf32, #tpu.memory_space<vmem>>, %arg8: memref<1x128xf32, #tpu.memory_space<vmem>>) attributes {dimension_semantics = [], scalar_prefetch = 0 : i64, scratch_operands = 0 : i64, tpu.core_type = #tpu.core_type<tc>} {
    %c0 = arith.constant 0 : index
    %c0_0 = arith.constant 0 : index
    %0 = vector.load %arg0[%c0, %c0_0] : memref<32x32xf32, #tpu.memory_space<vmem>>, vector<32x32xf32>
    %cst = arith.constant dense<0.000000e+00> : vector<32xf32>
    %1 = vector.multi_reduction <add>, %0, %cst [1] : vector<32x32xf32> to vector<32xf32>
    %2 = vector.shape_cast %1 : vector<32xf32> to vector<32x1xf32>
    %cst_1 = arith.constant 3.200000e+01 : f32
    %3 = vector.broadcast %cst_1 : f32 to vector<32x1xf32>
    %4 = arith.divf %2, %3 : vector<32x1xf32>
    %5 = vector.broadcast %4 : vector<32x1xf32> to vector<32x32xf32>
    %6 = arith.subf %0, %5 : vector<32x32xf32>
    %7 = arith.mulf %6, %6 : vector<32x32xf32>
    %cst_2 = arith.constant dense<0.000000e+00> : vector<32xf32>
    %8 = vector.multi_reduction <add>, %7, %cst_2 [1] : vector<32x32xf32> to vector<32xf32>
    %9 = vector.shape_cast %8 : vector<32xf32> to vector<32x1xf32>
    %cst_3 = arith.constant 3.200000e+01 : f32
    %10 = vector.broadcast %cst_3 : f32 to vector<32x1xf32>
    %11 = arith.divf %9, %10 : vector<32x1xf32>
    %cst_4 = arith.constant 9.99999974E-6 : f32
    %12 = vector.broadcast %cst_4 : f32 to vector<32x1xf32>
    %13 = arith.addf %11, %12 : vector<32x1xf32>
    %14 = math.rsqrt %13 : vector<32x1xf32>
    %15 = vector.broadcast %14 : vector<32x1xf32> to vector<32x32xf32>
    %16 = arith.mulf %6, %15 : vector<32x32xf32>
    %c0_5 = arith.constant 0 : index
    %c0_6 = arith.constant 0 : index
    %17 = vector.load %arg3[%c0_5, %c0_6] : memref<33x12xf32, #tpu.memory_space<vmem>>, vector<33x12xf32>
    %18 = vector.extract_strided_slice %17 {offsets = [0, 0], sizes = [32, 12], strides = [1, 1]} : vector<33x12xf32> to vector<32x12xf32>
    %19 = vector.extract_strided_slice %17 {offsets = [32, 0], sizes = [1, 12], strides = [1, 1]} : vector<33x12xf32> to vector<1x12xf32>
    %c0_7 = arith.constant 0 : index
    %c0_8 = arith.constant 0 : index
    %20 = vector.load %arg1[%c0_7, %c0_8] : memref<10x32xf32, #tpu.memory_space<vmem>>, vector<1x32xf32>
    %c1 = arith.constant 1 : index
    %c0_9 = arith.constant 0 : index
    %21 = vector.load %arg1[%c1, %c0_9] : memref<10x32xf32, #tpu.memory_space<vmem>>, vector<1x32xf32>
    %c0_10 = arith.constant 0 : index
    %c0_11 = arith.constant 0 : index
    %c0_12 = arith.constant 0 : index
    %22 = vector.load %arg2[%c0_10, %c0_11, %c0_12] : memref<2x32x32xf32, #tpu.memory_space<vmem>>, vector<1x32x32xf32>
    %23 = vector.shape_cast %22 : vector<1x32x32xf32> to vector<32x32xf32>
    %c8 = arith.constant 8 : index
    %c0_13 = arith.constant 0 : index
    %24 = vector.load %arg1[%c8, %c0_13] : memref<10x32xf32, #tpu.memory_space<vmem>>, vector<1x32xf32>
    %c2 = arith.constant 2 : index
    %c0_14 = arith.constant 0 : index
    %25 = vector.load %arg1[%c2, %c0_14] : memref<10x32xf32, #tpu.memory_space<vmem>>, vector<1x32xf32>
    %c3 = arith.constant 3 : index
    %c0_15 = arith.constant 0 : index
    %26 = vector.load %arg1[%c3, %c0_15] : memref<10x32xf32, #tpu.memory_space<vmem>>, vector<1x32xf32>
    %27 = vector.extract_strided_slice %18 {offsets = [0, 0], sizes = [32, 8], strides = [1, 1]} : vector<32x12xf32> to vector<32x8xf32>
    %28 = vector.extract_strided_slice %19 {offsets = [0, 0], sizes = [1, 8], strides = [1, 1]} : vector<1x12xf32> to vector<1x8xf32>
    %29 = vector.broadcast %20 : vector<1x32xf32> to vector<32x32xf32>
    %30 = arith.mulf %16, %29 : vector<32x32xf32>
    %31 = vector.broadcast %21 : vector<1x32xf32> to vector<32x32xf32>
    %32 = arith.addf %30, %31 : vector<32x32xf32>
    %cst_16 = arith.constant dense<0.000000e+00> : vector<32x32xf32>
    %33 = tpu.matmul %32, %23, %cst_16 {dimension_numbers = #tpu.dot_dimension_numbers<[1], [0], [0], [1], [0, 0, 1, 1], [], []>, precision = #tpu.contract_precision<fp32>} : vector<32x32xf32>, vector<32x32xf32>, vector<32x32xf32> -> vector<32x32xf32>
    %34 = vector.broadcast %24 : vector<1x32xf32> to vector<32x32xf32>
    %35 = arith.addf %33, %34 : vector<32x32xf32>
    %cst_17 = arith.constant dense<0.000000e+00> : vector<32xf32>
    %36 = vector.multi_reduction <add>, %35, %cst_17 [1] : vector<32x32xf32> to vector<32xf32>
    %37 = vector.shape_cast %36 : vector<32xf32> to vector<32x1xf32>
    %cst_18 = arith.constant 3.200000e+01 : f32
    %38 = vector.broadcast %cst_18 : f32 to vector<32x1xf32>
    %39 = arith.divf %37, %38 : vector<32x1xf32>
    %40 = vector.broadcast %39 : vector<32x1xf32> to vector<32x32xf32>
    %41 = arith.subf %35, %40 : vector<32x32xf32>
    %42 = arith.mulf %41, %41 : vector<32x32xf32>
    %cst_19 = arith.constant dense<0.000000e+00> : vector<32xf32>
    %43 = vector.multi_reduction <add>, %42, %cst_19 [1] : vector<32x32xf32> to vector<32xf32>
    %44 = vector.shape_cast %43 : vector<32xf32> to vector<32x1xf32>
    %cst_20 = arith.constant 3.200000e+01 : f32
    %45 = vector.broadcast %cst_20 : f32 to vector<32x1xf32>
    %46 = arith.divf %44, %45 : vector<32x1xf32>
    %cst_21 = arith.constant 9.99999974E-6 : f32
    %47 = vector.broadcast %cst_21 : f32 to vector<32x1xf32>
    %48 = arith.addf %46, %47 : vector<32x1xf32>
    %49 = math.rsqrt %48 : vector<32x1xf32>
    %50 = vector.broadcast %49 : vector<32x1xf32> to vector<32x32xf32>
    %51 = arith.mulf %41, %50 : vector<32x32xf32>
    %52 = vector.broadcast %25 : vector<1x32xf32> to vector<32x32xf32>
    %53 = arith.mulf %51, %52 : vector<32x32xf32>
    %54 = vector.broadcast %26 : vector<1x32xf32> to vector<32x32xf32>
    %55 = arith.addf %53, %54 : vector<32x32xf32>
    %cst_22 = arith.constant 0.000000e+00 : f32
    %56 = vector.broadcast %cst_22 : f32 to vector<32x32xf32>
    %57 = arith.maximumf %55, %56 : vector<32x32xf32>
    %cst_23 = arith.constant dense<0.000000e+00> : vector<32x8xf32>
    %58 = tpu.matmul %57, %27, %cst_23 {dimension_numbers = #tpu.dot_dimension_numbers<[1], [0], [0], [1], [0, 0, 1, 1], [], []>, precision = #tpu.contract_precision<fp32>} : vector<32x32xf32>, vector<32x8xf32>, vector<32x8xf32> -> vector<32x8xf32>
    %59 = vector.broadcast %28 : vector<1x8xf32> to vector<32x8xf32>
    %60 = arith.addf %58, %59 : vector<32x8xf32>
    %c4 = arith.constant 4 : index
    %c0_24 = arith.constant 0 : index
    %61 = vector.load %arg1[%c4, %c0_24] : memref<10x32xf32, #tpu.memory_space<vmem>>, vector<1x32xf32>
    %c5 = arith.constant 5 : index
    %c0_25 = arith.constant 0 : index
    %62 = vector.load %arg1[%c5, %c0_25] : memref<10x32xf32, #tpu.memory_space<vmem>>, vector<1x32xf32>
    %c1_26 = arith.constant 1 : index
    %c0_27 = arith.constant 0 : index
    %c0_28 = arith.constant 0 : index
    %63 = vector.load %arg2[%c1_26, %c0_27, %c0_28] : memref<2x32x32xf32, #tpu.memory_space<vmem>>, vector<1x32x32xf32>
    %64 = vector.shape_cast %63 : vector<1x32x32xf32> to vector<32x32xf32>
    %c9 = arith.constant 9 : index
    %c0_29 = arith.constant 0 : index
    %65 = vector.load %arg1[%c9, %c0_29] : memref<10x32xf32, #tpu.memory_space<vmem>>, vector<1x32xf32>
    %c6 = arith.constant 6 : index
    %c0_30 = arith.constant 0 : index
    %66 = vector.load %arg1[%c6, %c0_30] : memref<10x32xf32, #tpu.memory_space<vmem>>, vector<1x32xf32>
    %c7 = arith.constant 7 : index
    %c0_31 = arith.constant 0 : index
    %67 = vector.load %arg1[%c7, %c0_31] : memref<10x32xf32, #tpu.memory_space<vmem>>, vector<1x32xf32>
    %68 = vector.extract_strided_slice %18 {offsets = [0, 8], sizes = [32, 4], strides = [1, 1]} : vector<32x12xf32> to vector<32x4xf32>
    %69 = vector.extract_strided_slice %19 {offsets = [0, 8], sizes = [1, 4], strides = [1, 1]} : vector<1x12xf32> to vector<1x4xf32>
    %70 = vector.broadcast %61 : vector<1x32xf32> to vector<32x32xf32>
    %71 = arith.mulf %16, %70 : vector<32x32xf32>
    %72 = vector.broadcast %62 : vector<1x32xf32> to vector<32x32xf32>
    %73 = arith.addf %71, %72 : vector<32x32xf32>
    %cst_32 = arith.constant dense<0.000000e+00> : vector<32x32xf32>
    %74 = tpu.matmul %73, %64, %cst_32 {dimension_numbers = #tpu.dot_dimension_numbers<[1], [0], [0], [1], [0, 0, 1, 1], [], []>, precision = #tpu.contract_precision<fp32>} : vector<32x32xf32>, vector<32x32xf32>, vector<32x32xf32> -> vector<32x32xf32>
    %75 = vector.broadcast %65 : vector<1x32xf32> to vector<32x32xf32>
    %76 = arith.addf %74, %75 : vector<32x32xf32>
    %cst_33 = arith.constant dense<0.000000e+00> : vector<32xf32>
    %77 = vector.multi_reduction <add>, %76, %cst_33 [1] : vector<32x32xf32> to vector<32xf32>
    %78 = vector.shape_cast %77 : vector<32xf32> to vector<32x1xf32>
    %cst_34 = arith.constant 3.200000e+01 : f32
    %79 = vector.broadcast %cst_34 : f32 to vector<32x1xf32>
    %80 = arith.divf %78, %79 : vector<32x1xf32>
    %81 = vector.broadcast %80 : vector<32x1xf32> to vector<32x32xf32>
    %82 = arith.subf %76, %81 : vector<32x32xf32>
    %83 = arith.mulf %82, %82 : vector<32x32xf32>
    %cst_35 = arith.constant dense<0.000000e+00> : vector<32xf32>
    %84 = vector.multi_reduction <add>, %83, %cst_35 [1] : vector<32x32xf32> to vector<32xf32>
    %85 = vector.shape_cast %84 : vector<32xf32> to vector<32x1xf32>
    %cst_36 = arith.constant 3.200000e+01 : f32
    %86 = vector.broadcast %cst_36 : f32 to vector<32x1xf32>
    %87 = arith.divf %85, %86 : vector<32x1xf32>
    %cst_37 = arith.constant 9.99999974E-6 : f32
    %88 = vector.broadcast %cst_37 : f32 to vector<32x1xf32>
    %89 = arith.addf %87, %88 : vector<32x1xf32>
    %90 = math.rsqrt %89 : vector<32x1xf32>
    %91 = vector.broadcast %90 : vector<32x1xf32> to vector<32x32xf32>
    %92 = arith.mulf %82, %91 : vector<32x32xf32>
    %93 = vector.broadcast %66 : vector<1x32xf32> to vector<32x32xf32>
    %94 = arith.mulf %92, %93 : vector<32x32xf32>
    %95 = vector.broadcast %67 : vector<1x32xf32> to vector<32x32xf32>
    %96 = arith.addf %94, %95 : vector<32x32xf32>
    %cst_38 = arith.constant 0.000000e+00 : f32
    %97 = vector.broadcast %cst_38 : f32 to vector<32x32xf32>
    %98 = arith.maximumf %96, %97 : vector<32x32xf32>
    %cst_39 = arith.constant dense<0.000000e+00> : vector<32x4xf32>
    %99 = tpu.matmul %98, %68, %cst_39 {dimension_numbers = #tpu.dot_dimension_numbers<[1], [0], [0], [1], [0, 0, 1, 1], [], []>, precision = #tpu.contract_precision<fp32>} : vector<32x32xf32>, vector<32x4xf32>, vector<32x4xf32> -> vector<32x4xf32>
    %100 = vector.broadcast %69 : vector<1x4xf32> to vector<32x4xf32>
    %101 = arith.addf %99, %100 : vector<32x4xf32>
    %c0_40 = arith.constant 0 : index
    %c0_41 = arith.constant 0 : index
    %c0_42 = arith.constant 0 : index
    %102 = vector.load %arg4[%c0_40, %c0_41, %c0_42] : memref<6x32x4xf32, #tpu.memory_space<vmem>>, vector<1x32x4xf32>
    %103 = vector.shape_cast %102 : vector<1x32x4xf32> to vector<32x4xf32>
    %c1_43 = arith.constant 1 : index
    %c0_44 = arith.constant 0 : index
    %c0_45 = arith.constant 0 : index
    %104 = vector.load %arg4[%c1_43, %c0_44, %c0_45] : memref<6x32x4xf32, #tpu.memory_space<vmem>>, vector<1x32x4xf32>
    %105 = vector.shape_cast %104 : vector<1x32x4xf32> to vector<32x4xf32>
    %c2_46 = arith.constant 2 : index
    %c0_47 = arith.constant 0 : index
    %c0_48 = arith.constant 0 : index
    %106 = vector.load %arg4[%c2_46, %c0_47, %c0_48] : memref<6x32x4xf32, #tpu.memory_space<vmem>>, vector<1x32x4xf32>
    %107 = vector.shape_cast %106 : vector<1x32x4xf32> to vector<32x4xf32>
    %c3_49 = arith.constant 3 : index
    %c0_50 = arith.constant 0 : index
    %c0_51 = arith.constant 0 : index
    %108 = vector.load %arg4[%c3_49, %c0_50, %c0_51] : memref<6x32x4xf32, #tpu.memory_space<vmem>>, vector<1x32x4xf32>
    %109 = vector.shape_cast %108 : vector<1x32x4xf32> to vector<32x4xf32>
    %c4_52 = arith.constant 4 : index
    %c0_53 = arith.constant 0 : index
    %c0_54 = arith.constant 0 : index
    %110 = vector.load %arg4[%c4_52, %c0_53, %c0_54] : memref<6x32x4xf32, #tpu.memory_space<vmem>>, vector<1x32x4xf32>
    %111 = vector.shape_cast %110 : vector<1x32x4xf32> to vector<32x4xf32>
    %c5_55 = arith.constant 5 : index
    %c0_56 = arith.constant 0 : index
    %c0_57 = arith.constant 0 : index
    %112 = vector.load %arg4[%c5_55, %c0_56, %c0_57] : memref<6x32x4xf32, #tpu.memory_space<vmem>>, vector<1x32x4xf32>
    %113 = vector.shape_cast %112 : vector<1x32x4xf32> to vector<32x4xf32>
    %114 = arith.negf %101 : vector<32x4xf32>
    %115 = math.exp %114 : vector<32x4xf32>
    %cst_58 = arith.constant 1.000000e+00 : f32
    %116 = vector.broadcast %cst_58 : f32 to vector<32x4xf32>
    %117 = arith.addf %116, %115 : vector<32x4xf32>
    %118 = arith.divf %116, %117 : vector<32x4xf32>
    %119 = arith.mulf %118, %105 : vector<32x4xf32>
    %120 = math.log %119 : vector<32x4xf32>
    %cst_59 = arith.constant -1.000000e+02 : f32
    %121 = vector.broadcast %cst_59 : f32 to vector<32x4xf32>
    %122 = arith.maximumf %120, %121 : vector<32x4xf32>
    %cst_60 = arith.constant 1.000000e+00 : f32
    %123 = vector.broadcast %cst_60 : f32 to vector<32x4xf32>
    %124 = arith.subf %123, %119 : vector<32x4xf32>
    %125 = math.log %124 : vector<32x4xf32>
    %cst_61 = arith.constant -1.000000e+02 : f32
    %126 = vector.broadcast %cst_61 : f32 to vector<32x4xf32>
    %127 = arith.maximumf %125, %126 : vector<32x4xf32>
    %128 = arith.mulf %103, %122 : vector<32x4xf32>
    %cst_62 = arith.constant 1.000000e+00 : f32
    %129 = vector.broadcast %cst_62 : f32 to vector<32x4xf32>
    %130 = arith.subf %129, %103 : vector<32x4xf32>
    %131 = arith.mulf %130, %127 : vector<32x4xf32>
    %132 = arith.addf %128, %131 : vector<32x4xf32>
    %cst_63 = arith.constant 0.000000e+00 : f32
    %133 = vector.broadcast %cst_63 : f32 to vector<32x4xf32>
    %134 = arith.subf %133, %132 : vector<32x4xf32>
    %135 = vector.shape_cast %134 : vector<32x4xf32> to vector<1x32x4xf32>
    %cst_64 = arith.constant dense<0.000000e+00> : vector<1xf32>
    %136 = vector.multi_reduction <add>, %135, %cst_64 [1, 2] : vector<1x32x4xf32> to vector<1xf32>
    %137 = vector.shape_cast %136 : vector<1xf32> to vector<1x1x1xf32>
    %138 = vector.extract %137[0, 0, 0] : f32 from vector<1x1x1xf32>
    %c0_65 = arith.constant 0 : index
    %139 = memref.load %arg5[%c0_65] : memref<1xf32, #tpu.memory_space<smem>>
    %140 = vector.broadcast %139 : f32 to vector<32x4xf32>
    %141 = arith.cmpf oge, %103, %140 : vector<32x4xf32>
    %cst_66 = arith.constant 0.000000e+00 : f32
    %142 = vector.broadcast %cst_66 : f32 to vector<32x4xf32>
    %143 = arith.select %141, %103, %142 : vector<32x4xi1>, vector<32x4xf32>
    %144 = vector.extract_strided_slice %60 {offsets = [0, 0], sizes = [32, 4], strides = [1, 1]} : vector<32x8xf32> to vector<32x4xf32>
    %145 = arith.addf %107, %144 : vector<32x4xf32>
    %146 = arith.mulf %145, %143 : vector<32x4xf32>
    %147 = vector.extract_strided_slice %60 {offsets = [0, 4], sizes = [32, 4], strides = [1, 1]} : vector<32x8xf32> to vector<32x4xf32>
    %148 = arith.addf %109, %147 : vector<32x4xf32>
    %149 = arith.mulf %148, %143 : vector<32x4xf32>
    %150 = arith.mulf %111, %143 : vector<32x4xf32>
    %151 = arith.subf %146, %150 : vector<32x4xf32>
    %152 = math.absf %151 : vector<32x4xf32>
    %cst_67 = arith.constant 1.000000e+00 : f32
    %153 = vector.broadcast %cst_67 : f32 to vector<32x4xf32>
    %154 = arith.cmpf olt, %152, %153 : vector<32x4xf32>
    %cst_68 = arith.constant 5.000000e-01 : f32
    %155 = vector.broadcast %cst_68 : f32 to vector<32x4xf32>
    %156 = arith.mulf %155, %152 : vector<32x4xf32>
    %157 = arith.mulf %156, %152 : vector<32x4xf32>
    %cst_69 = arith.constant 5.000000e-01 : f32
    %158 = vector.broadcast %cst_69 : f32 to vector<32x4xf32>
    %159 = arith.subf %152, %158 : vector<32x4xf32>
    %160 = arith.select %154, %157, %159 : vector<32x4xi1>, vector<32x4xf32>
    %161 = vector.shape_cast %160 : vector<32x4xf32> to vector<1x32x4xf32>
    %cst_70 = arith.constant dense<0.000000e+00> : vector<1xf32>
    %162 = vector.multi_reduction <add>, %161, %cst_70 [1, 2] : vector<1x32x4xf32> to vector<1xf32>
    %163 = vector.shape_cast %162 : vector<1xf32> to vector<1x1x1xf32>
    %164 = vector.extract %163[0, 0, 0] : f32 from vector<1x1x1xf32>
    %165 = arith.mulf %113, %143 : vector<32x4xf32>
    %166 = arith.subf %149, %165 : vector<32x4xf32>
    %167 = math.absf %166 : vector<32x4xf32>
    %cst_71 = arith.constant 1.000000e+00 : f32
    %168 = vector.broadcast %cst_71 : f32 to vector<32x4xf32>
    %169 = arith.cmpf olt, %167, %168 : vector<32x4xf32>
    %cst_72 = arith.constant 5.000000e-01 : f32
    %170 = vector.broadcast %cst_72 : f32 to vector<32x4xf32>
    %171 = arith.mulf %170, %167 : vector<32x4xf32>
    %172 = arith.mulf %171, %167 : vector<32x4xf32>
    %cst_73 = arith.constant 5.000000e-01 : f32
    %173 = vector.broadcast %cst_73 : f32 to vector<32x4xf32>
    %174 = arith.subf %167, %173 : vector<32x4xf32>
    %175 = arith.select %169, %172, %174 : vector<32x4xi1>, vector<32x4xf32>
    %176 = vector.shape_cast %175 : vector<32x4xf32> to vector<1x32x4xf32>
    %cst_74 = arith.constant dense<0.000000e+00> : vector<1xf32>
    %177 = vector.multi_reduction <add>, %176, %cst_74 [1, 2] : vector<1x32x4xf32> to vector<1xf32>
    %178 = vector.shape_cast %177 : vector<1xf32> to vector<1x1x1xf32>
    %179 = vector.extract %178[0, 0, 0] : f32 from vector<1x1x1xf32>
    %180 = arith.addf %164, %179 : f32
    %c0_75 = arith.constant 0 : index
    %c0_76 = arith.constant 0 : index
    %181 = vector.load %arg6[%c0_75, %c0_76] : memref<2x128xf32, #tpu.memory_space<vmem>>, vector<2x128xf32>
    %c0_77 = arith.constant 0 : index
    %c0_78 = arith.constant 0 : index
    %182 = vector.load %arg7[%c0_77, %c0_78] : memref<2x128xf32, #tpu.memory_space<vmem>>, vector<2x128xf32>
    %cst_79 = arith.constant 0.000000e+00 : f32
    %183 = vector.broadcast %cst_79 : f32 to vector<2x128xf32>
    %184 = arith.maximumf %181, %183 : vector<2x128xf32>
    %185 = arith.mulf %182, %181 : vector<2x128xf32>
    %186 = arith.subf %184, %185 : vector<2x128xf32>
    %187 = math.absf %181 : vector<2x128xf32>
    %cst_80 = arith.constant 0.000000e+00 : f32
    %188 = vector.broadcast %cst_80 : f32 to vector<2x128xf32>
    %189 = arith.subf %188, %187 : vector<2x128xf32>
    %190 = math.exp %189 : vector<2x128xf32>
    %cst_81 = arith.constant 1.000000e+00 : f32
    %191 = vector.broadcast %cst_81 : f32 to vector<2x128xf32>
    %192 = arith.addf %191, %190 : vector<2x128xf32>
    %193 = math.log %192 : vector<2x128xf32>
    %194 = arith.addf %186, %193 : vector<2x128xf32>
    %195 = vector.shape_cast %194 : vector<2x128xf32> to vector<1x2x128xf32>
    %cst_82 = arith.constant dense<0.000000e+00> : vector<1xf32>
    %196 = vector.multi_reduction <add>, %195, %cst_82 [1, 2] : vector<1x2x128xf32> to vector<1xf32>
    %197 = vector.shape_cast %196 : vector<1xf32> to vector<1x1x1xf32>
    %198 = vector.extract %197[0, 0, 0] : f32 from vector<1x1x1xf32>
    %cst_83 = arith.constant 2.560000e+02 : f32
    %199 = arith.divf %180, %cst_83 : f32
    %cst_84 = arith.constant 1.280000e+02 : f32
    %200 = arith.divf %138, %cst_84 : f32
    %cst_85 = arith.constant 1.280000e+02 : f32
    %201 = arith.divf %198, %cst_85 : f32
    %cst_86 = arith.constant 1.000000e+00 : f32
    %202 = arith.mulf %cst_86, %200 : f32
    %cst_87 = arith.constant 5.000000e+00 : f32
    %203 = arith.mulf %cst_87, %199 : f32
    %204 = arith.addf %202, %203 : f32
    %cst_88 = arith.constant 1.000000e+00 : f32
    %205 = arith.mulf %cst_88, %201 : f32
    %206 = arith.addf %204, %205 : f32
    %207 = tpu.iota {dimensions = array<i32: 1>} : vector<1x128xi32>
    %c0_i32 = arith.constant 0 : i32
    %208 = vector.broadcast %c0_i32 : i32 to vector<1x128xi32>
    %209 = arith.cmpi eq, %207, %208 : vector<1x128xi32>
    %cst_89 = arith.constant 0.000000e+00 : f32
    %210 = vector.broadcast %206 : f32 to vector<1x128xf32>
    %211 = vector.broadcast %cst_89 : f32 to vector<1x128xf32>
    %212 = arith.select %209, %210, %211 : vector<1x128xi1>, vector<1x128xf32>
    %c1_i32 = arith.constant 1 : i32
    %213 = vector.broadcast %c1_i32 : i32 to vector<1x128xi32>
    %214 = arith.cmpi eq, %207, %213 : vector<1x128xi32>
    %cst_90 = arith.constant 0.000000e+00 : f32
    %215 = vector.broadcast %199 : f32 to vector<1x128xf32>
    %216 = vector.broadcast %cst_90 : f32 to vector<1x128xf32>
    %217 = arith.select %214, %215, %216 : vector<1x128xi1>, vector<1x128xf32>
    %218 = arith.addf %212, %217 : vector<1x128xf32>
    %c2_i32 = arith.constant 2 : i32
    %219 = vector.broadcast %c2_i32 : i32 to vector<1x128xi32>
    %220 = arith.cmpi eq, %207, %219 : vector<1x128xi32>
    %cst_91 = arith.constant 0.000000e+00 : f32
    %221 = vector.broadcast %200 : f32 to vector<1x128xf32>
    %222 = vector.broadcast %cst_91 : f32 to vector<1x128xf32>
    %223 = arith.select %220, %221, %222 : vector<1x128xi1>, vector<1x128xf32>
    %224 = arith.addf %218, %223 : vector<1x128xf32>
    %c3_i32 = arith.constant 3 : i32
    %225 = vector.broadcast %c3_i32 : i32 to vector<1x128xi32>
    %226 = arith.cmpi eq, %207, %225 : vector<1x128xi32>
    %cst_92 = arith.constant 0.000000e+00 : f32
    %227 = vector.broadcast %201 : f32 to vector<1x128xf32>
    %228 = vector.broadcast %cst_92 : f32 to vector<1x128xf32>
    %229 = arith.select %226, %227, %228 : vector<1x128xi1>, vector<1x128xf32>
    %230 = arith.addf %224, %229 : vector<1x128xf32>
    %c0_93 = arith.constant 0 : index
    %c0_94 = arith.constant 0 : index
    %231 = vector.load %arg8[%c0_93, %c0_94] : memref<1x128xf32, #tpu.memory_space<vmem>>, vector<1x128xf32>
    tpu.vector_store %arg8[%c0_93, %c0_94], %230 {strides = array<i32>} : memref<1x128xf32, #tpu.memory_space<vmem>>, vector<1x128xf32>,
    return
  }
}

</mosaic_0001>

<bundles_post_ra>
// kernel: tpu_custom_call.1
= control target key start
LH: loop header
LB: loop body
LE: loop exit
PB: predicated region body
PF: predicated region fallthrough
CT: control target
= control target key end

     0   :  { %vm35_vm0 = vcmask 261120   ;;  %s2826_s0 = inlined_call_operand.vmem [shape: f32[32,32], index: 0, kind: input, shape index: {}]   ;;  %s2827_s1 = inlined_call_operand.vmem [shape: f32[10,32], index: 1, kind: input, shape index: {}]   ;;  %s2828_s2 = inlined_call_operand.vmem [shape: f32[2,32,32], index: 2, kind: input, shape index: {}]   ;;  %s2829_s3 = inlined_call_operand.vmem [shape: f32[33,12], index: 3, kind: input, shape index: {}]   ;;  %s2830_s4 = inlined_call_operand.vmem [shape: f32[6,32,4], index: 4, kind: input, shape index: {}]   ;;  %s2831_s5 = inlined_call_operand.<no memory space> [shape: f32[1], index: 5, kind: input, shape index: {}]   ;;  %s2832_s6 = inlined_call_operand.vmem [shape: f32[2,128], index: 6, kind: input, shape index: {}]   ;;  %s2833_s7 = inlined_call_operand.vmem [shape: f32[2,128], index: 7, kind: input, shape index: {}]   ;;  %s2834_s8 = inlined_call_operand.hbm [shape: f32[1,128], index: 8, kind: output, shape index: {}]  }
   0x1   :  { %v33_v0 = vld [vmem:[%s2826_s0 + $0x10] sm:$0xff]  ;;  %v31_v1 = vld [vmem:[%s2826_s0] sm:$0xff]  ;;  %v34_v4 = vld [vmem:[%s2826_s0 + $0x18] sm:$0xff] }
   0x2   :  { %v42_v2 = vsel %vm35_vm0, %v33_v0, 0.0  ;;  %v36_v3 = vsel %vm35_vm0, %v31_v1, 0.0  ;;  %v32_v5 = vld [vmem:[%s2826_s0 + $0x8] sm:$0xff] }
   0x3   :  { %43 = vadd.xlane.f32.xlu1 %v42_v2  ;;  %37 = vadd.xlane.f32.xlu0 %v36_v3 }
   0x4   :  { %14 = vsyncpa [#allocation4], 0  ;;  %v45_v6 = vsel %vm35_vm0, %v34_v4, 0.0  ;;  %v39_v7 = vsel %vm35_vm0, %v32_v5, 0.0  ;;  %v2124_v8 = vmov 32.0   ;;  %v141_v35 = vld [vmem:[%s2828_s2 + $0x18] sm:$0xff] }
   0x5   :  { %2028 = vrcp.f32 %v2124_v8  ;;  %v180_v36 = vand.u32 4294901760, %v141_v35  ;;  %v140_v37 = vld [vmem:[%s2828_s2 + $0x10] sm:$0xff]  ;;  %v139_v40 = vld [vmem:[%s2828_s2 + $0x8] sm:$0xff]  ;;  %v138_v44 = vld [vmem:[%s2828_s2] sm:$0xff]  ;;  %s2125_s29 = smov 120   ;;  %s2126_s30 = smov 124  }
   0x6   :  { %v182_v39 = vand.u32 4294901760, %v140_v37  ;;  %v184_v43 = vand.u32 4294901760, %v139_v40  ;;  %v186_v48 = vand.u32 4294901760, %v138_v44  ;;  %s1954_s9 = sshll.u32 %s2834_s8, 4  ;;  %s1955_s9 = int_to_ptr.hbm [resolvable:$true] %s1954_s9 }
   0x7   :  { %v234_v38 = vsub.f32 %v141_v35, %v180_v36  ;;  %332 = vmatpush.msra.mxu3 %v180_v36  ;;  %181 = vmatpush.msra.mxu0 %v180_v36 }
   0x8   :  { %v240_v42 = vsub.f32 %v140_v37, %v182_v39  ;;  %v246_v47 = vsub.f32 %v139_v40, %v184_v43  ;;  %v252_v52 = vsub.f32 %v138_v44, %v186_v48 }
   0x9   :  { %v235_v41 = vand.u32 4294901760, %v234_v38  ;;  %288 = vmatpush.msra.mxu2 %v234_v38  ;;  %334 = vmatpush.msra.mxu3 %v182_v39 }
   0xa   :  { %183 = vmatpush.msra.mxu0 %v182_v39  ;;  %v241_v46 = vand.u32 4294901760, %v240_v42  ;;  %v247_v51 = vand.u32 4294901760, %v246_v47  ;;  %v253_v55 = vand.u32 4294901760, %v252_v52 }
   0xb   :  { %46 = vadd.xlane.f32.xlu1 %v45_v6  ;;  %40 = vadd.xlane.f32.xlu0 %v39_v7  ;;  %v2029_v9 = vpop.eup %2028  ;;  %v236_v45 = vsub.f32 %v234_v38, %v235_v41 }
   0xc   :  { %v49_v10 = vmul.f32 32.0, %v2029_v9  ;;  %vm53_vm1 = vweird.f32 %v2029_v9  ;;  %291 = vmatpush.msra.mxu2 %v240_v42  ;;  %336 = vmatpush.msra.mxu3 %v184_v43  ;;  %v242_v50 = vsub.f32 %v240_v42, %v241_v46  ;;  %v248_v54 = vsub.f32 %v246_v47, %v247_v51 }
   0xd   :  { %185 = vmatpush.msra.mxu0 %v184_v43  ;;  %v237_v49 = vand.u32 4294901760, %v236_v45  ;;  %v254_v57 = vsub.f32 %v252_v52, %v253_v55 }
   0xe   :  { %v50_v11 = vsub.f32 1.0, %v49_v10  ;;  %294 = vmatpush.msra.mxu2 %v246_v47  ;;  %338 = vmatpush.msra.mxu3 %v186_v48  ;;  %v243_v53 = vand.u32 4294901760, %v242_v50  ;;  %v249_v56 = vand.u32 4294901760, %v248_v54 }
   0xf   :  { %187 = vmatpush.msra.mxu0 %v186_v48  ;;  %238 = vmatpush.msra.mxu1 %v237_v49  ;;  %v255_v58 = vand.u32 4294901760, %v254_v57 }
  0x10   :  { %v51_v12 = vmul.f32 %v2029_v9, %v50_v11  ;;  %297 = vmatpush.msra.mxu2 %v252_v52 }
  0x11   :  { %379 = vmatpush.msrb.mxu0 %v235_v41  ;;  %244 = vmatpush.msra.mxu1 %v243_v53 }
  0x12   :  { %v52_v13 = vadd.f32 %v2029_v9, %v51_v12 }
  0x13   :  { %383 = vmatpush.msrb.mxu0 %v241_v46  ;;  %250 = vmatpush.msra.mxu1 %v249_v56 }
  0x14   :  { %v2191_v14 = vsel %vm53_vm1, %v2029_v9, %v52_v13 }
  0x15   :  { %387 = vmatpush.msrb.mxu0 %v247_v51  ;;  %256 = vmatpush.msra.mxu1 %v255_v58 }
  0x17   :  { %422 = vmatpush.msrb.mxu1 %v180_v36  ;;  %391 = vmatpush.msrb.mxu0 %v253_v55 }
  0x19   :  { %424 = vmatpush.msrb.mxu1 %v182_v39 }
  0x1b   :  { %426 = vmatpush.msrb.mxu1 %v184_v43 }
  0x1d   :  { %428 = vmatpush.msrb.mxu1 %v186_v48 }
  0x76   :  { %v44_v15 = vpop.xlane.xlu1 %43  ;;  %v38_v16 = vpop.xlane.xlu0 %37 }
  0x77   :  { %v57_v17 = vmul.f32 %v2191_v14, %v44_v15  ;;  %v55_v18 = vmul.f32 %v2191_v14, %v38_v16 }
  0x79   :  { %v2195_v19 = vsub.f32 %v33_v0, %v57_v17  ;;  %v2197_v20 = vsub.f32 %v31_v1, %v55_v18 }
  0x7b   :  { %v65_v21 = vmul.f32 %v2195_v19, %v2195_v19  ;;  %v63_v22 = vmul.f32 %v2197_v20, %v2197_v20 }
  0x7d   :  { %v73_v23 = vsel %vm35_vm0, %v65_v21, 0.0  ;;  %v67_v24 = vsel %vm35_vm0, %v63_v22, 0.0 }
  0x7e   :  { %v47_v25 = vpop.xlane.xlu1 %46  ;;  %74 = vadd.xlane.f32.xlu0 %v73_v23  ;;  %68 = vadd.xlane.f32.xlu2 %v67_v24  ;;  %v41_v26 = vpop.xlane.xlu0 %40  ;;  %v2017_v24 = vld [vmem:[%s2827_s1] ss:$0 sm:$0xff] }
  0x7f   :  { %v58_v27 = vmul.f32 %v2191_v14, %v47_v25  ;;  %v56_v28 = vmul.f32 %v2191_v14, %v41_v26 }
  0x81   :  { %v2207_v29 = vsub.f32 %v34_v4, %v58_v27  ;;  %v2209_v30 = vsub.f32 %v32_v5, %v56_v28 }
  0x83   :  { %v66_v31 = vmul.f32 %v2207_v29, %v2207_v29  ;;  %v64_v32 = vmul.f32 %v2209_v30, %v2209_v30 }
  0x85   :  { %v76_v33 = vsel %vm35_vm0, %v66_v31, 0.0  ;;  %v70_v34 = vsel %vm35_vm0, %v64_v32, 0.0 }
  0x86   :  { %77 = vadd.xlane.f32.xlu1 %v76_v33  ;;  %71 = vadd.xlane.f32.xlu2 %v70_v34  ;;  %v2020_v34 = vld [vmem:[%s2827_s1 + $0x1] ss:$0 sm:$0xff] }
  0xf1   :  { %v69_v59 = vpop.xlane.xlu2 %68  ;;  %v75_v60 = vpop.xlane.xlu0 %74 }
  0xf2   :  { %v79_v61 = vmul.f32 %v69_v59, %v2191_v14  ;;  %v81_v62 = vmul.f32 %v75_v60, %v2191_v14 }
  0xf4   :  { %v83_v63 = vadd.f32 1e-05, %v79_v61  ;;  %v85_v0 = vadd.f32 1e-05, %v81_v62 }
  0xf6   :  { %2030 = vrsqrt.f32 %v83_v63  ;;  %vm113_vm2 = vweird.f32 %v85_v0  ;;  %vm93_vm5 = vweird.f32 %v83_v63 }
  0xf7   :  { %2032 = vrsqrt.f32 %v85_v0 }
  0xf9   :  { %v78_v1 = vpop.xlane.xlu1 %77  ;;  %v72_v2 = vpop.xlane.xlu2 %71 }
  0xfa   :  { %v82_v3 = vmul.f32 %v78_v1, %v2191_v14  ;;  %v80_v4 = vmul.f32 %v72_v2, %v2191_v14 }
  0xfc   :  { %v2031_v5 = vpop.eup %2030  ;;  %v86_v6 = vadd.f32 1e-05, %v82_v3  ;;  %v84_v7 = vadd.f32 1e-05, %v80_v4 }
  0xfd   :  { %v2033_v8 = vpop.eup %2032  ;;  %v88_v9 = vmul.f32 %v2031_v5, %v83_v63  ;;  %vm94_vm4 = vweird.f32 %v2031_v5 }
  0xfe   :  { %v108_v10 = vmul.f32 %v2033_v8, %v85_v0  ;;  %2034 = vrsqrt.f32 %v86_v6  ;;  %vm114_vm3 = vweird.f32 %v2033_v8  ;;  %vm95_vm7 = vmor %vm93_vm5, %vm94_vm4  ;;  %vm123_vm8 = vweird.f32 %v86_v6 }
  0xff   :  { %v89_v11 = vmul.f32 %v2031_v5, %v88_v9  ;;  %2036 = vrsqrt.f32 %v84_v7  ;;  %vm115_vm6 = vmor %vm113_vm2, %vm114_vm3  ;;  %vm103_vm12 = vweird.f32 %v84_v7 }
 0x100   :  { %v109_v12 = vmul.f32 %v2033_v8, %v108_v10 }
 0x101   :  { %v90_v13 = vmul.f32 0.5, %v89_v11 }
 0x102   :  { %v110_v15 = vmul.f32 0.5, %v109_v12 }
 0x103   :  { %v91_v16 = vsub.f32 1.5, %v90_v13 }
 0x104   :  { %v2035_v17 = vpop.eup %2034  ;;  %v111_v18 = vsub.f32 1.5, %v110_v15 }
 0x105   :  { %v2037_v21 = vpop.eup %2036  ;;  %v92_v22 = vmul.f32 %v2031_v5, %v91_v16  ;;  %v118_v23 = vmul.f32 %v2035_v17, %v86_v6  ;;  %vm124_vm9 = vweird.f32 %v2035_v17  ;;  %v2021_v16 = vld [vmem:[%s2827_s1 + $0x8] ss:$0 sm:$0xff] }
 0x106   :  { %v112_v25 = vmul.f32 %v2033_v8, %v111_v18  ;;  %v98_v26 = vmul.f32 %v2037_v21, %v84_v7  ;;  %vm125_vm10 = vmor %vm123_vm8, %vm124_vm9  ;;  %vm104_vm11 = vweird.f32 %v2037_v21 }
 0x107   :  { %v96_v27 = vsel %vm95_vm7, %v2031_v5, %v92_v22  ;;  %v119_v28 = vmul.f32 %v2035_v17, %v118_v23  ;;  %vm105_vm13 = vmor %vm103_vm12, %vm104_vm11 }
 0x108   :  { %v2237_v31 = vmul.f32 %v96_v27, %v2197_v20  ;;  %v116_v32 = vsel %vm115_vm6, %v2033_v8, %v112_v25  ;;  %v99_v33 = vmul.f32 %v2037_v21, %v98_v26 }
 0x109   :  { %v2243_v35 = vmul.f32 %v116_v32, %v2195_v19  ;;  %v120_v36 = vmul.f32 0.5, %v119_v28 }
 0x10a   :  { %v146_v37 = vmul.f32 %v2017_v24, %v2237_v31  ;;  %v100_v38 = vmul.f32 0.5, %v99_v33 }
 0x10b   :  { %v121_v39 = vsub.f32 1.5, %v120_v36  ;;  %v148_v41 = vmul.f32 %v2017_v24, %v2243_v35 }
 0x10c   :  { %v101_v40 = vsub.f32 1.5, %v100_v38  ;;  %v151_v20 = vadd.f32 %v2020_v34, %v146_v37 }
 0x10d   :  { %v122_v42 = vmul.f32 %v2035_v17, %v121_v39  ;;  %v153_v50 = vadd.f32 %v2020_v34, %v148_v41 }
 0x10e   :  { %v102_v43 = vmul.f32 %v2037_v21, %v101_v40  ;;  %v157_v44 = vsel %vm35_vm0, %v151_v20, 0 }
 0x10f   :  { %v126_v19 = vsel %vm125_vm10, %v2035_v17, %v122_v42  ;;  %v188_v45 = vand.u32 4294901760, %v157_v44  ;;  %v163_v56 = vsel %vm35_vm0, %v153_v50, 0 }
 0x110   :  { %v106_v46 = vsel %vm105_vm13, %v2037_v21, %v102_v43  ;;  %v2249_v47 = vmul.f32 %v126_v19, %v2207_v29 }
 0x111   :  { %v2252_v48 = vmul.f32 %v106_v46, %v2209_v30  ;;  %258 = vmatmul.f32.vlgmr.msra.gmra.mxu1 %v188_v45  ;;  %v189_v49 = vsub.f32 %v157_v44, %v188_v45  ;;  %v204_v30 = vand.u32 4294901760, %v163_v56 }
 0x112   :  { %v149_v53 = vmul.f32 %v2017_v24, %v2249_v47 }
 0x113   :  { %v147_v51 = vmul.f32 %v2017_v24, %v2252_v48  ;;  %300 = vmatmul.f32.vlgmr.msra.gmra.mxu2 %v189_v49  ;;  %v190_v52 = vand.u32 4294901760, %v189_v49  ;;  %v205_v62 = vsub.f32 %v163_v56, %v204_v30 }
 0x114   :  { %v154_v59 = vadd.f32 %v2020_v34, %v149_v53 }
 0x115   :  { %342 = vmatmul.f32.vlgmr.msra.gmra.mxu3 %v190_v52  ;;  %v191_v54 = vsub.f32 %v189_v49, %v190_v52  ;;  %v152_v55 = vadd.f32 %v2020_v34, %v147_v51  ;;  %v206_v2 = vand.u32 4294901760, %v205_v62 }
 0x116   :  { %v166_v63 = vsel %vm35_vm0, %v154_v59, 0 }
 0x117   :  { %v192_v57 = vand.u32 4294901760, %v191_v54  ;;  %v160_v29 = vsel %vm35_vm0, %v152_v55, 0  ;;  %v212_v3 = vand.u32 4294901760, %v166_v63  ;;  %v207_v4 = vsub.f32 %v205_v62, %v206_v2 }
 0x118   :  { %v196_v58 = vand.u32 4294901760, %v160_v29 }
 0x119   :  { %193 = vmatmul.f32.vlgmr.msra.gmra.mxu0 %v192_v57  ;;  %v213_v5 = vsub.f32 %v166_v63, %v212_v3  ;;  %v208_v6 = vand.u32 4294901760, %v207_v4 }
 0x11a   :  { %262 = vmatmul.f32.gmra.mxu1 %v196_v58  ;;  %v197_v60 = vsub.f32 %v160_v29, %v196_v58 }
 0x11b   :  { %v214_v7 = vand.u32 4294901760, %v213_v5 }
 0x11c   :  { %305 = vmatmul.f32.gmra.mxu2 %v197_v60  ;;  %v198_v61 = vand.u32 4294901760, %v197_v60 }
 0x11d   :  { %v215_v8 = vsub.f32 %v213_v5, %v214_v7 }
 0x11e   :  { %348 = vmatmul.f32.gmra.mxu3 %v198_v61  ;;  %v199_v0 = vsub.f32 %v197_v60, %v198_v61 }
 0x11f   :  { %v216_v9 = vand.u32 4294901760, %v215_v8 }
 0x120   :  { %v200_v1 = vand.u32 4294901760, %v199_v0 }
 0x122   :  { %201 = vmatmul.f32.gmra.mxu0 %v200_v1  ;;  %266 = vmatmul.f32.gmra.mxu1 %v204_v30 }
 0x124   :  { %310 = vmatmul.f32.gmra.mxu2 %v205_v62 }
 0x126   :  { %354 = vmatmul.f32.gmra.mxu3 %v206_v2 }
 0x12a   :  { %209 = vmatmul.f32.gmra.mxu0 %v208_v6  ;;  %270 = vmatmul.f32.gmra.mxu1 %v212_v3 }
 0x12c   :  { %315 = vmatmul.f32.gmra.mxu2 %v213_v5 }
 0x12e   :  { %360 = vmatmul.f32.gmra.mxu3 %v214_v7 }
 0x132   :  { %217 = vmatmul.f32.gmra.mxu0 %v216_v9  ;;  %430 = vmatmul.f32.vlgmr.msrb.gmra.mxu1 %v188_v45 }
 0x13a   :  { %393 = vmatmul.f32.vlgmr.msrb.gmra.mxu0 %v188_v45  ;;  %434 = vmatmul.f32.gmra.mxu1 %v196_v58 }
 0x142   :  { %397 = vmatmul.f32.gmra.mxu0 %v196_v58  ;;  %438 = vmatmul.f32.gmra.mxu1 %v204_v30 }
 0x14a   :  { %401 = vmatmul.f32.gmra.mxu0 %v204_v30  ;;  %442 = vmatmul.f32.gmra.mxu1 %v212_v3 }
 0x152   :  { %405 = vmatmul.f32.gmra.mxu0 %v212_v3 }
 0x18e   :  { %v259_v10 = vpop.f32.mrf.mxu1 }
 0x196   :  { %v194_v11 = vpop.f32.mrf.mxu0  ;;  %v301_v22 = vpop.f32.mrf.mxu2 }
 0x197   :  { %v263_v12 = vpop.f32.mrf.mxu1  ;;  %v195_v21 = vadd.f32 %v2021_v16, %v194_v11 }
 0x198   :  { %v343_v24 = vpop.f32.mrf.mxu3 }
 0x199   :  { %v260_v23 = vadd.f32 %v259_v10, %v195_v21 }
 0x19b   :  { %v302_v26 = vadd.f32 %v301_v22, %v260_v23 }
 0x19d   :  { %v344_v33 = vadd.f32 %v343_v24, %v302_v26 }
 0x19f   :  { %v202_v13 = vpop.f32.mrf.mxu0  ;;  %v267_v15 = vpop.f32.mrf.mxu1 }
 0x1a0   :  { %v203_v27 = vadd.f32 %v2021_v16, %v202_v13  ;;  %v306_v32 = vpop.f32.mrf.mxu2 }
 0x1a1   :  { %v349_v38 = vpop.f32.mrf.mxu3 }
 0x1a2   :  { %v264_v34 = vadd.f32 %v263_v12, %v203_v27  ;;  %v2293_v27 = vld [vmem:[%s2829_s3 + $0x18] sm:$0xff] }
 0x1a4   :  { %v307_v39 = vadd.f32 %v306_v32, %v264_v34  ;;  %v2299_v32 = vld [vmem:[%s2829_s3 + $0x10] sm:$0xff] }
 0x1a5   :  { %v575_v34 = vand.u32 4294901760, %v2299_v32 }
 0x1a6   :  { %v350_v43 = vadd.f32 %v349_v38, %v307_v39 }
 0x1a7   :  { %v210_v17 = vpop.f32.mrf.mxu0  ;;  %v271_v18 = vpop.f32.mrf.mxu1  ;;  %v633_v38 = vsub.f32 %v2299_v32, %v575_v34 }
 0x1a8   :  { %v211_v40 = vadd.f32 %v2021_v16, %v210_v17  ;;  %v311_v19 = vpop.f32.mrf.mxu2 }
 0x1a9   :  { %v355_v52 = vpop.f32.mrf.mxu3 }
 0x1aa   :  { %v268_v44 = vadd.f32 %v267_v15, %v211_v40  ;;  %v2313_v40 = vld [vmem:[%s2829_s3] sm:$0xff] }
 0x1ac   :  { %v312_v49 = vadd.f32 %v311_v19, %v268_v44 }
 0x1ae   :  { %v356_v54 = vadd.f32 %v355_v52, %v312_v49 }
 0x1af   :  { %v218_v25 = vpop.f32.mrf.mxu0  ;;  %v431_v28 = vpop.f32.mrf.mxu1 }
 0x1b0   :  { %v219_v50 = vadd.f32 %v2021_v16, %v218_v25  ;;  %v316_v58 = vpop.f32.mrf.mxu2 }
 0x1b1   :  { %v361_v61 = vpop.f32.mrf.mxu3 }
 0x1b2   :  { %v272_v55 = vadd.f32 %v271_v18, %v219_v50 }
 0x1b4   :  { %v317_v30 = vadd.f32 %v316_v58, %v272_v55 }
 0x1b6   :  { %v362_v62 = vadd.f32 %v361_v61, %v317_v30 }
 0x1b7   :  { %v394_v36 = vpop.f32.mrf.mxu0  ;;  %v435_v42 = vpop.f32.mrf.mxu1 }
 0x1b8   :  { %v395_v37 = vadd.f32 %v394_v36, %v344_v33  ;;  %v2306_v36 = vld [vmem:[%s2829_s3 + $0x8] sm:$0xff] }
 0x1b9   :  { %v577_v39 = vand.u32 4294901760, %v2306_v36 }
 0x1ba   :  { %v432_v20 = vadd.f32 %v431_v28, %v395_v37  ;;  %v573_v28 = vand.u32 4294901760, %v2293_v27 }
 0x1bc   :  { %v446_v41 = vsel %vm35_vm0, %v432_v20, 0.0  ;;  %v627_v33 = vsub.f32 %v2293_v27, %v573_v28  ;;  %574 = vmatpush.msrb.mxu2 %v573_v28  ;;  %725 = vmatpush.msra.mxu1 %v573_v28 }
 0x1bd   :  { %447 = vadd.xlane.f32.xlu2 %v446_v41  ;;  %v634_v41 = vand.u32 4294901760, %v633_v38 }
 0x1be   :  { %v628_v37 = vand.u32 4294901760, %v627_v33  ;;  %681 = vmatpush.msra.mxu0 %v627_v33  ;;  %727 = vmatpush.msra.mxu1 %v575_v34 }
 0x1bf   :  { %v398_v45 = vpop.f32.mrf.mxu0  ;;  %v439_v56 = vpop.f32.mrf.mxu1  ;;  %576 = vmatpush.msrb.mxu2 %v575_v34  ;;  %v635_v19 = vsub.f32 %v633_v38, %v634_v41 }
 0x1c0   :  { %v399_v46 = vadd.f32 %v398_v45, %v350_v43  ;;  %684 = vmatpush.msra.mxu0 %v633_v38  ;;  %v579_v43 = vand.u32 4294901760, %v2313_v40  ;;  %729 = vmatpush.msra.mxu1 %v577_v39 }
 0x1c1   :  { %578 = vmatpush.msrb.mxu2 %v577_v39  ;;  %v636_v49 = vand.u32 4294901760, %v635_v19 }
 0x1c2   :  { %v436_v51 = vadd.f32 %v435_v42, %v399_v46  ;;  %v639_v42 = vsub.f32 %v2306_v36, %v577_v39  ;;  %v645_v46 = vsub.f32 %v2313_v40, %v579_v43  ;;  %731 = vmatpush.msra.mxu1 %v579_v43 }
 0x1c3   :  { %580 = vmatpush.msrb.mxu2 %v579_v43 }
 0x1c4   :  { %v449_v53 = vsel %vm35_vm0, %v436_v51, 0.0  ;;  %v640_v45 = vand.u32 4294901760, %v639_v42  ;;  %687 = vmatpush.msra.mxu0 %v639_v42 }
 0x1c5   :  { %450 = vadd.xlane.f32.xlu0 %v449_v53  ;;  %772 = vmatpush.msra.mxu2 %v628_v37 }
 0x1c6   :  { %v641_v50 = vsub.f32 %v639_v42, %v640_v45  ;;  %690 = vmatpush.msra.mxu0 %v645_v46 }
 0x1c7   :  { %v402_v57 = vpop.f32.mrf.mxu0  ;;  %v443_v1 = vpop.f32.mrf.mxu1  ;;  %776 = vmatpush.msra.mxu2 %v634_v41  ;;  %v1963_v41 = vld [vmem:[%s2828_s2 + $0x20] sm:$0xff] }
 0x1c8   :  { %v403_v29 = vadd.f32 %v402_v57, %v356_v54  ;;  %v642_v52 = vand.u32 4294901760, %v641_v50 }
 0x1c9   :  { %780 = vmatpush.msra.mxu2 %v640_v45 }
 0x1ca   :  { %v440_v59 = vadd.f32 %v439_v56, %v403_v29 }
 0x1cc   :  { %v452_v60 = vsel %vm35_vm0, %v440_v59, 0.0 }
 0x1cd   :  { %453 = vadd.xlane.f32.xlu1 %v452_v60 }
 0x1cf   :  { %v406_v63 = vpop.f32.mrf.mxu0 }
 0x1d0   :  { %v407_v0 = vadd.f32 %v406_v63, %v362_v62 }
 0x1d2   :  { %v444_v2 = vadd.f32 %v443_v1, %v407_v0 }
 0x1d4   :  { %v455_v3 = vsel %vm35_vm0, %v444_v2, 0.0 }
 0x1d5   :  { %456 = vadd.xlane.f32.xlu2 %v455_v3 }
 0x230   :  { %v448_v4 = vpop.xlane.xlu2 %447 }
 0x231   :  { %v458_v5 = vmul.f32 %v448_v4, %v2191_v14 }
 0x233   :  { %v2267_v6 = vsub.f32 %v432_v20, %v458_v5  ;;  %v629_v20 = vsub.f32 %v627_v33, %v628_v37 }
 0x235   :  { %v466_v7 = vmul.f32 %v2267_v6, %v2267_v6  ;;  %v630_v44 = vand.u32 4294901760, %v629_v20 }
 0x237   :  { %v470_v8 = vsel %vm35_vm0, %v466_v7, 0.0  ;;  %631 = vmatpush.msrb.mxu3 %v630_v44  ;;  %v2326_v7 = vld [vmem:[%s2827_s1 + $0x2] ss:$0 sm:$0xff] }
 0x238   :  { %v451_v9 = vpop.xlane.xlu0 %450  ;;  %471 = vadd.xlane.f32.xlu0 %v470_v8  ;;  %v1966_v8 = vld [vmem:[%s2828_s2 + $0x38] sm:$0xff] }
 0x239   :  { %v459_v10 = vmul.f32 %v451_v9, %v2191_v14  ;;  %637 = vmatpush.msrb.mxu3 %v636_v49 }
 0x23b   :  { %v2273_v11 = vsub.f32 %v436_v51, %v459_v10  ;;  %v646_v51 = vand.u32 4294901760, %v645_v46  ;;  %643 = vmatpush.msrb.mxu3 %v642_v52 }
 0x23d   :  { %v467_v12 = vmul.f32 %v2273_v11, %v2273_v11  ;;  %v647_v53 = vsub.f32 %v645_v46, %v646_v51  ;;  %784 = vmatpush.msra.mxu2 %v646_v51  ;;  %v2373_v51 = vand.u32 4294901760, %v1963_v41 }
 0x23f   :  { %v473_v13 = vsel %vm35_vm0, %v467_v12, 0.0  ;;  %v648_v55 = vand.u32 4294901760, %v647_v53  ;;  %v2332_v12 = vand.u32 4294901760, %v1966_v8 }
 0x240   :  { %474 = vadd.xlane.f32.xlu1 %v473_v13  ;;  %v454_v15 = vpop.xlane.xlu1 %453 }
 0x241   :  { %v460_v16 = vmul.f32 %v454_v15, %v2191_v14  ;;  %649 = vmatpush.msrb.mxu3 %v648_v55  ;;  %v2338_v15 = vld [vmem:[%s2827_s1 + $0x3] ss:$0 sm:$0xff]  ;;  %885 = vmatpush.msrb.mxu0 %v2332_v12 }
 0x243   :  { %v2279_v17 = vsub.f32 %v440_v59, %v460_v16  ;;  %815 = vmatpush.msra.mxu3 %v573_v28  ;;  %v1965_v16 = vld [vmem:[%s2828_s2 + $0x30] sm:$0xff] }
 0x245   :  { %v468_v18 = vmul.f32 %v2279_v17, %v2279_v17  ;;  %817 = vmatpush.msra.mxu3 %v575_v34 }
 0x247   :  { %v476_v21 = vsel %vm35_vm0, %v468_v18, 0.0  ;;  %819 = vmatpush.msra.mxu3 %v577_v39 }
 0x248   :  { %v457_v22 = vpop.xlane.xlu2 %456  ;;  %477 = vadd.xlane.f32.xlu2 %v476_v21 }
 0x249   :  { %v461_v23 = vmul.f32 %v457_v22, %v2191_v14  ;;  %821 = vmatpush.msra.mxu3 %v579_v43  ;;  %v2345_v22 = vsub.f32 %v1966_v8, %v2332_v12 }
 0x24b   :  { %v2285_v24 = vsub.f32 %v444_v2, %v461_v23  ;;  %v2347_v23 = vand.u32 4294901760, %v1965_v16  ;;  %v939_v33 = vand.u32 4294901760, %v2345_v22 }
 0x24d   :  { %v469_v25 = vmul.f32 %v2285_v24, %v2285_v24  ;;  %887 = vmatpush.msrb.mxu0 %v2347_v23  ;;  %v2359_v37 = vsub.f32 %v1965_v16, %v2347_v23  ;;  %v940_v44 = vsub.f32 %v2345_v22, %v939_v33 }
 0x24f   :  { %v479_v26 = vsel %vm35_vm0, %v469_v25, 0.0  ;;  %v945_v45 = vand.u32 4294901760, %v2359_v37  ;;  %v941_v50 = vand.u32 4294901760, %v940_v44 }
 0x250   :  { %480 = vadd.xlane.f32.xlu0 %v479_v26  ;;  %v1964_v26 = vld [vmem:[%s2828_s2 + $0x28] sm:$0xff] }
 0x251   :  { %v2356_v34 = vand.u32 4294901760, %v1964_v26  ;;  %942 = vmatpush.msrb.mxu1 %v941_v50 }
 0x253   :  { %889 = vmatpush.msrb.mxu0 %v2356_v34  ;;  %v2379_v55 = vsub.f32 %v1964_v26, %v2356_v34 }
 0x255   :  { %891 = vmatpush.msrb.mxu0 %v2373_v51 }
 0x2ab   :  { %v472_v54 = vpop.xlane.xlu0 %471 }
 0x2ac   :  { %v482_v56 = vmul.f32 %v472_v54, %v2191_v14  ;;  %v946_v54 = vsub.f32 %v2359_v37, %v945_v45 }
 0x2ae   :  { %v486_v57 = vadd.f32 1e-05, %v482_v56 }
 0x2b0   :  { %2038 = vrsqrt.f32 %v486_v57  ;;  %vm496_vm15 = vweird.f32 %v486_v57 }
 0x2b3   :  { %v475_v29 = vpop.xlane.xlu1 %474 }
 0x2b4   :  { %v483_v58 = vmul.f32 %v475_v29, %v2191_v14  ;;  %v2385_v29 = vsub.f32 %v1963_v41, %v2373_v51 }
 0x2b6   :  { %v2039_v30 = vpop.eup %2038  ;;  %v487_v59 = vadd.f32 1e-05, %v483_v58 }
 0x2b7   :  { %v491_v60 = vmul.f32 %v2039_v30, %v486_v57  ;;  %vm497_vm14 = vweird.f32 %v2039_v30 }
 0x2b8   :  { %2040 = vrsqrt.f32 %v487_v59  ;;  %vm498_vm1 = vmor %vm496_vm15, %vm497_vm14  ;;  %vm506_vm3 = vweird.f32 %v487_v59  ;;  %vm1719_vm15 = vcmask 31744  }
 0x2b9   :  { %v492_v61 = vmul.f32 %v2039_v30, %v491_v60 }
 0x2bb   :  { %v493_v62 = vmul.f32 0.5, %v492_v61  ;;  %v478_v63 = vpop.xlane.xlu2 %477  ;;  %v957_v61 = vand.u32 4294901760, %v2385_v29 }
 0x2bc   :  { %v484_v0 = vmul.f32 %v478_v63, %v2191_v14  ;;  %v2395_v63 = vld [vmem:[%s2827_s1 + $0x4] ss:$0 sm:$0xff] }
 0x2bd   :  { %v494_v1 = vsub.f32 1.5, %v493_v62 }
 0x2be   :  { %v2041_v2 = vpop.eup %2040  ;;  %v2321_v3 = vadd.f32 1e-05, %v484_v0 }
 0x2bf   :  { %v495_v4 = vmul.f32 %v2039_v30, %v494_v1  ;;  %v501_v5 = vmul.f32 %v2041_v2, %v487_v59  ;;  %vm507_vm2 = vweird.f32 %v2041_v2 }
 0x2c0   :  { %2042 = vrsqrt.f32 %v2321_v3  ;;  %vm508_vm4 = vmor %vm506_vm3, %vm507_vm2  ;;  %vm516_vm6 = vweird.f32 %v2321_v3 }
 0x2c1   :  { %v499_v9 = vsel %vm498_vm1, %v2039_v30, %v495_v4  ;;  %v502_v10 = vmul.f32 %v2041_v2, %v501_v5  ;;  %v947_v30 = vand.u32 4294901760, %v946_v54 }
 0x2c2   :  { %v530_v13 = vmul.f32 %v499_v9, %v2267_v6 }
 0x2c3   :  { %v503_v18 = vmul.f32 0.5, %v502_v10  ;;  %v481_v21 = vpop.xlane.xlu0 %480  ;;  %948 = vmatpush.msrb.mxu1 %v947_v30  ;;  %v958_v10 = vsub.f32 %v2385_v29, %v957_v61 }
 0x2c4   :  { %v535_v6 = vmul.f32 %v2326_v7, %v530_v13  ;;  %v485_v25 = vmul.f32 %v481_v21, %v2191_v14  ;;  %v850_v21 = vmul.f32 %v2395_v63, %v2237_v31 }
 0x2c5   :  { %v504_v28 = vsub.f32 1.5, %v503_v18  ;;  %v959_v26 = vand.u32 4294901760, %v958_v10 }
 0x2c6   :  { %v2043_v38 = vpop.eup %2042  ;;  %v2361_v39 = vadd.f32 1e-05, %v485_v25  ;;  %v540_v20 = vadd.f32 %v2338_v15, %v535_v6 }
 0x2c7   :  { %v505_v42 = vmul.f32 %v2041_v2, %v504_v28  ;;  %v511_v43 = vmul.f32 %v2043_v38, %v2321_v3  ;;  %vm517_vm5 = vweird.f32 %v2043_v38  ;;  %v2408_v3 = vld [vmem:[%s2827_s1 + $0x5] ss:$0 sm:$0xff] }
 0x2c8   :  { %2044 = vrsqrt.f32 %v2361_v39  ;;  %v544_v19 = vmax.f32 %v540_v20, 0.0  ;;  %vm518_vm7 = vmor %vm516_vm6, %vm517_vm5  ;;  %vm526_vm9 = vweird.f32 %v2361_v39 }
 0x2c9   :  { %v509_v46 = vsel %vm508_vm4, %v2041_v2, %v505_v42  ;;  %v512_v49 = vmul.f32 %v2043_v38, %v511_v43 }
 0x2ca   :  { %v531_v52 = vmul.f32 %v509_v46, %v2273_v11  ;;  %v550_v53 = vsel %vm35_vm0, %v544_v19, 0  ;;  %v951_v11 = vand.u32 4294901760, %v2379_v55 }
 0x2cb   :  { %v513_v56 = vmul.f32 0.5, %v512_v49  ;;  %v2381_v57 = vand.u32 4294901760, %v550_v53 }
 0x2cc   :  { %v536_v58 = vmul.f32 %v2326_v7, %v531_v52  ;;  %v952_v1 = vsub.f32 %v2379_v55, %v951_v11 }
 0x2cd   :  { %v514_v59 = vsub.f32 1.5, %v513_v56  ;;  %651 = vmatmul.f32.vlgmr.msrb.gmra.mxu3 %v2381_v57  ;;  %v582_v60 = vsub.f32 %v550_v53, %v2381_v57 }
 0x2ce   :  { %v2045_v62 = vpop.eup %2044  ;;  %v541_v0 = vadd.f32 %v2338_v15, %v536_v58  ;;  %1036 = vmatpush.msrb.mxu3 %v2332_v12  ;;  %v953_v9 = vand.u32 4294901760, %v952_v1  ;;  %v852_v58 = vmul.f32 %v2395_v63, %v2243_v35  ;;  %v853_v35 = vmul.f32 %v2395_v63, %v2249_v47 }
 0x2cf   :  { %v515_v2 = vmul.f32 %v2043_v38, %v514_v59  ;;  %v521_v4 = vmul.f32 %v2045_v62, %v2361_v39  ;;  %693 = vmatmul.f32.vlgmr.msra.gmra.mxu0 %v582_v60  ;;  %v583_v5 = vand.u32 4294901760, %v582_v60  ;;  %vm527_vm8 = vweird.f32 %v2045_v62 }
 0x2d0   :  { %v545_v8 = vmax.f32 %v541_v0, 0.0  ;;  %1038 = vmatpush.msrb.mxu3 %v2347_v23  ;;  %1083 = vmatpush.msra.mxu0 %v939_v33  ;;  %vm528_vm10 = vmor %vm526_vm9, %vm527_vm8  ;;  %v851_v39 = vmul.f32 %v2395_v63, %v2252_v48  ;;  %v858_v10 = vadd.f32 %v2408_v3, %v853_v35 }
 0x2d1   :  { %v519_v13 = vsel %vm518_vm7, %v2043_v38, %v515_v2  ;;  %v522_v16 = vmul.f32 %v2045_v62, %v521_v4  ;;  %735 = vmatmul.f32.vlgmr.msra.gmra.mxu1 %v583_v5  ;;  %v584_v18 = vsub.f32 %v582_v60, %v583_v5  ;;  %v857_v60 = vadd.f32 %v2408_v3, %v852_v58 }
 0x2d2   :  { %v532_v6 = vmul.f32 %v519_v13, %v2279_v17  ;;  %v553_v25 = vsel %vm35_vm0, %v545_v8, 0  ;;  %954 = vmatpush.msrb.mxu1 %v953_v9  ;;  %1040 = vmatpush.msrb.mxu3 %v2356_v34  ;;  %v855_v17 = vadd.f32 %v2408_v3, %v850_v21 }
 0x2d3   :  { %v523_v28 = vmul.f32 0.5, %v522_v16  ;;  %v585_v33 = vand.u32 4294901760, %v584_v18  ;;  %v2415_v38 = vand.u32 4294901760, %v553_v25  ;;  %1087 = vmatpush.msra.mxu0 %v945_v45  ;;  %v867_v2 = vsel %vm35_vm0, %v857_v60, 0 }
 0x2d4   :  { %v537_v20 = vmul.f32 %v2326_v7, %v532_v6  ;;  %960 = vmatpush.msrb.mxu1 %v959_v26  ;;  %1042 = vmatpush.msrb.mxu3 %v2373_v51  ;;  %v908_v9 = vand.u32 4294901760, %v867_v2  ;;  %v870_v18 = vsel %vm35_vm0, %v858_v10, 0  ;;  %v2485_v60 = vstv %s2831_s5 }
 0x2d5   :  { %v524_v41 = vsub.f32 1.5, %v523_v28  ;;  %586 = vmatmul.f32.vlgmr.msrb.gmra.mxu2 %v585_v33  ;;  %655 = vmatmul.f32.gmra.mxu3 %v2415_v38  ;;  %v590_v31 = vsub.f32 %v553_v25, %v2415_v38  ;;  %v916_v21 = vand.u32 4294901760, %v870_v18 }
 0x2d6   :  { %v542_v42 = vadd.f32 %v2338_v15, %v537_v20  ;;  %992 = vmatpush.msrb.mxu2 %v2345_v22  ;;  %1126 = vmatpush.msra.mxu1 %v2332_v12  ;;  %v861_v12 = vsel %vm35_vm0, %v855_v17, 0  ;;  %v909_v16 = vsub.f32 %v867_v2, %v908_v9 }
 0x2d7   :  { %v525_v43 = vmul.f32 %v2045_v62, %v524_v41  ;;  %698 = vmatmul.f32.gmra.mxu0 %v590_v31  ;;  %v591_v44 = vand.u32 4294901760, %v590_v31  ;;  %v917_v25 = vsub.f32 %v870_v18, %v916_v21 }
 0x2d8   :  { %v546_v19 = vmax.f32 %v542_v42, 0.0  ;;  %1091 = vmatpush.msra.mxu0 %v951_v11  ;;  %1128 = vmatpush.msra.mxu1 %v2347_v23  ;;  %v910_v63 = vand.u32 4294901760, %v909_v16 }
 0x2d9   :  { %v529_v45 = vsel %vm528_vm10, %v2045_v62, %v525_v43  ;;  %741 = vmatmul.f32.gmra.mxu1 %v591_v44  ;;  %v592_v46 = vsub.f32 %v590_v31, %v591_v44  ;;  %995 = vmatpush.msrb.mxu2 %v2359_v37  ;;  %v2441_v37 = vand.u32 4294901760, %v861_v12  ;;  %v918_v26 = vand.u32 4294901760, %v917_v25  ;;  %v2469_v31 = vld [vmem:[%s2829_s3 + $0x20] ss:$0 sm:$0xff]  ;;  %s2129_s3 = smov [#allocation3]  }
 0x2da   :  { %v533_v49 = vmul.f32 %v529_v45, %v2285_v24  ;;  %v556_v22 = vsel %vm35_vm0, %v546_v19, 0  ;;  %1095 = vmatpush.msra.mxu0 %v957_v61  ;;  %1130 = vmatpush.msra.mxu1 %v2356_v34  ;;  %v856_v34 = vadd.f32 %v2408_v3, %v851_v39  ;;  %v911_v6 = vsub.f32 %v909_v16, %v910_v63  ;;  %s1952_s28 = sshll.u32 %s2129_s3, 4  ;;  %s1953_s28 = int_to_ptr.vmem [resolvable:$true] %s1952_s28 }
 0x2db   :  { %v593_v50 = vand.u32 4294901760, %v592_v46  ;;  %v2434_v52 = vand.u32 4294901760, %v556_v22  ;;  %998 = vmatpush.msrb.mxu2 %v2379_v55  ;;  %v919_v28 = vsub.f32 %v917_v25, %v918_v26 }
 0x2dc   :  { %v538_v23 = vmul.f32 %v2326_v7, %v533_v49  ;;  %1132 = vmatpush.msra.mxu1 %v2373_v51  ;;  %v893_v51 = vsub.f32 %v861_v12, %v2441_v37  ;;  %v864_v56 = vsel %vm35_vm0, %v856_v34, 0  ;;  %v912_v3 = vand.u32 4294901760, %v911_v6 }
 0x2dd   :  { %594 = vmatmul.f32.gmra.mxu2 %v593_v50  ;;  %659 = vmatmul.f32.gmra.mxu3 %v2434_v52  ;;  %v598_v24 = vsub.f32 %v556_v22, %v2434_v52  ;;  %v900_v59 = vand.u32 4294901760, %v864_v56 }
 0x2de   :  { %v543_v48 = vadd.f32 %v2338_v15, %v538_v23  ;;  %1001 = vmatpush.msrb.mxu2 %v2385_v29  ;;  %v894_v29 = vand.u32 4294901760, %v893_v51 }
 0x2df   :  { %703 = vmatmul.f32.gmra.mxu0 %v598_v24  ;;  %v599_v53 = vand.u32 4294901760, %v598_v24  ;;  %v901_v1 = vsub.f32 %v864_v56, %v900_v59 }
 0x2e0   :  { %v547_v54 = vmax.f32 %v543_v48, 0.0  ;;  %v895_v0 = vsub.f32 %v893_v51, %v894_v29 }
 0x2e1   :  { %747 = vmatmul.f32.gmra.mxu1 %v599_v53  ;;  %v600_v7 = vsub.f32 %v598_v24, %v599_v53  ;;  %v902_v8 = vand.u32 4294901760, %v901_v1 }
 0x2e2   :  { %v559_v55 = vsel %vm35_vm0, %v547_v54, 0  ;;  %v896_v5 = vand.u32 4294901760, %v895_v0 }
 0x2e3   :  { %v601_v30 = vand.u32 4294901760, %v600_v7  ;;  %v605_v15 = vand.u32 4294901760, %v559_v55  ;;  %v903_v13 = vsub.f32 %v901_v1, %v902_v8 }
 0x2e5   :  { %602 = vmatmul.f32.gmra.mxu2 %v601_v30  ;;  %663 = vmatmul.f32.gmra.mxu3 %v605_v15  ;;  %v606_v11 = vsub.f32 %v559_v55, %v605_v15  ;;  %v904_v47 = vand.u32 4294901760, %v903_v13  ;;  %v1563_v13 = vld [vmem:[%s2830_s4 + $0x8] sm:$0xff] }
 0x2e6   :  { %vm1739_vm12 = vcmp.ge.f32.partialorder %v1563_v13, %v2485_v60 }
 0x2e7   :  { %708 = vmatmul.f32.gmra.mxu0 %v606_v11  ;;  %v607_v61 = vand.u32 4294901760, %v606_v11 }
 0x2e9   :  { %753 = vmatmul.f32.gmra.mxu1 %v607_v61  ;;  %v608_v62 = vsub.f32 %v606_v11, %v607_v61 }
 0x2eb   :  { %v609_v4 = vand.u32 4294901760, %v608_v62 }
 0x2ed   :  { %610 = vmatmul.f32.gmra.mxu2 %v609_v4  ;;  %823 = vmatmul.f32.vlgmr.msra.gmra.mxu3 %v2381_v57 }
 0x2ef   :  { %897 = vmatmul.f32.vlgmr.msrb.gmra.mxu0 %v896_v5  ;;  %v1971_v5 = vld [vmem:[%s2830_s4 + $0x40] sm:$0xff] }
 0x2f1   :  { %962 = vmatmul.f32.vlgmr.msrb.gmra.mxu1 %v2441_v37 }
 0x2f5   :  { %786 = vmatmul.f32.vlgmr.msra.gmra.mxu2 %v2381_v57  ;;  %827 = vmatmul.f32.gmra.mxu3 %v2415_v38  ;;  %v920_v57 = vand.u32 4294901760, %v919_v28  ;;  %v1980_v28 = vld [vmem:[%s2830_s4 + $0x88] sm:$0xff] }
 0x2f7   :  { %905 = vmatmul.f32.gmra.mxu0 %v904_v47 }
 0x2f9   :  { %966 = vmatmul.f32.gmra.mxu1 %v900_v59 }
 0x2fd   :  { %790 = vmatmul.f32.gmra.mxu2 %v2415_v38  ;;  %831 = vmatmul.f32.gmra.mxu3 %v2434_v52 }
 0x2ff   :  { %913 = vmatmul.f32.gmra.mxu0 %v912_v3 }
 0x301   :  { %970 = vmatmul.f32.gmra.mxu1 %v908_v9 }
 0x305   :  { %794 = vmatmul.f32.gmra.mxu2 %v2434_v52  ;;  %835 = vmatmul.f32.gmra.mxu3 %v605_v15 }
 0x307   :  { %921 = vmatmul.f32.gmra.mxu0 %v920_v57  ;;  %v2517_v57 = vsel %vm1739_vm12, %v1563_v13, 0.0 }
 0x309   :  { %974 = vmatmul.f32.gmra.mxu1 %v916_v21 }
 0x30d   :  { %798 = vmatmul.f32.gmra.mxu2 %v605_v15  ;;  %1046 = vmatmul.f32.vlgmr.msrb.gmra.mxu3 %v894_v29 }
 0x30f   :  { %1097 = vmatmul.f32.vlgmr.msra.gmra.mxu0 %v2441_v37 }
 0x311   :  { %1134 = vmatmul.f32.vlgmr.msra.gmra.mxu1 %v2441_v37 }
 0x315   :  { %1004 = vmatmul.f32.vlgmr.msrb.gmra.mxu2 %v893_v51  ;;  %1052 = vmatmul.f32.gmra.mxu3 %v902_v8  ;;  %v1979_v8 = vld [vmem:[%s2830_s4 + $0x80] sm:$0xff] }
 0x317   :  { %1101 = vmatmul.f32.gmra.mxu0 %v900_v59 }
 0x319   :  { %1138 = vmatmul.f32.gmra.mxu1 %v900_v59  ;;  %v1562_v59 = vld [vmem:[%s2830_s4] sm:$0xff] }
 0x31a   :  { %vm1738_vm11 = vcmp.ge.f32.partialorder %v1562_v59, %v2485_v60 }
 0x31d   :  { %1009 = vmatmul.f32.gmra.mxu2 %v901_v1  ;;  %1058 = vmatmul.f32.gmra.mxu3 %v910_v63 }
 0x31f   :  { %1105 = vmatmul.f32.gmra.mxu0 %v908_v9 }
 0x321   :  { %1142 = vmatmul.f32.gmra.mxu1 %v908_v9  ;;  %v2498_v9 = vsel %vm1738_vm11, %v1562_v59, 0.0 }
 0x322   :  { %v1778_v18 = vmul.f32 %v1979_v8, %v2498_v9 }
 0x325   :  { %1014 = vmatmul.f32.gmra.mxu2 %v909_v16  ;;  %1064 = vmatmul.f32.gmra.mxu3 %v918_v26  ;;  %v1972_v26 = vld [vmem:[%s2830_s4 + $0x48] sm:$0xff] }
 0x327   :  { %1109 = vmatmul.f32.gmra.mxu0 %v916_v21 }
 0x329   :  { %1146 = vmatmul.f32.gmra.mxu1 %v916_v21 }
 0x32d   :  { %1019 = vmatmul.f32.gmra.mxu2 %v917_v25 }
 0x34c   :  { %v694_v33 = vpop.f32.mrf.mxu0 }
 0x34e   :  { %v736_v38 = vpop.f32.mrf.mxu1 }
 0x350   :  { %v652_v20 = vpop.f32.mrf.mxu3 }
 0x354   :  { %v699_v41 = vpop.f32.mrf.mxu0 }
 0x356   :  { %v742_v17 = vpop.f32.mrf.mxu1 }
 0x358   :  { %v587_v42 = vpop.f32.mrf.mxu2  ;;  %v656_v43 = vpop.f32.mrf.mxu3 }
 0x359   :  { %v588_v44 = vadd.f32 %v2469_v31, %v587_v42  ;;  %v1779_v42 = vmul.f32 %v1980_v28, %v2517_v57 }
 0x35b   :  { %v653_v19 = vadd.f32 %v652_v20, %v588_v44 }
 0x35c   :  { %v704_v45 = vpop.f32.mrf.mxu0 }
 0x35d   :  { %v695_v46 = vadd.f32 %v694_v33, %v653_v19 }
 0x35e   :  { %v748_v49 = vpop.f32.mrf.mxu1 }
 0x35f   :  { %v737_v22 = vadd.f32 %v736_v38, %v695_v46 }
 0x360   :  { %v595_v12 = vpop.f32.mrf.mxu2  ;;  %v660_v39 = vpop.f32.mrf.mxu3 }
 0x361   :  { %v596_v50 = vadd.f32 %v2469_v31, %v595_v12 }
 0x363   :  { %v657_v52 = vadd.f32 %v656_v43, %v596_v50 }
 0x364   :  { %v709_v23 = vpop.f32.mrf.mxu0 }
 0x365   :  { %v700_v24 = vadd.f32 %v699_v41, %v657_v52  ;;  %v1564_v41 = vld [vmem:[%s2830_s4 + $0x10] sm:$0xff] }
 0x366   :  { %v754_v37 = vpop.f32.mrf.mxu1  ;;  %vm1740_vm13 = vcmp.ge.f32.partialorder %v1564_v41, %v2485_v60 }
 0x367   :  { %v743_v48 = vadd.f32 %v742_v17, %v700_v24  ;;  %v2536_v12 = vsel %vm1740_vm13, %v1564_v41, 0.0 }
 0x368   :  { %v603_v34 = vpop.f32.mrf.mxu2  ;;  %v664_v53 = vpop.f32.mrf.mxu3 }
 0x369   :  { %v604_v54 = vadd.f32 %v2469_v31, %v603_v34 }
 0x36b   :  { %v661_v7 = vadd.f32 %v660_v39, %v604_v54 }
 0x36c   :  { %v2474_v51 = vpop.f32.mrf.mxu0 }
 0x36d   :  { %v705_v55 = vadd.f32 %v704_v45, %v661_v7 }
 0x36e   :  { %v2476_v56 = vpop.f32.mrf.mxu1 }
 0x36f   :  { %v749_v58 = vadd.f32 %v748_v49, %v705_v55  ;;  %v1973_v49 = vld [vmem:[%s2830_s4 + $0x50] sm:$0xff]  ;;  %v2553_v55 = vld [vmem:[%s2827_s1 + $0x9] ss:$0 sm:$0xff] }
 0x370   :  { %v611_v30 = vpop.f32.mrf.mxu2  ;;  %v824_v15 = vpop.f32.mrf.mxu3  ;;  %v899_v13 = vadd.f32 %v2553_v55, %v2474_v51 }
 0x371   :  { %v612_v11 = vadd.f32 %v2469_v31, %v611_v30 }
 0x373   :  { %v665_v29 = vadd.f32 %v664_v53, %v612_v11 }
 0x374   :  { %v2487_v62 = vpop.f32.mrf.mxu0 }
 0x375   :  { %v710_v61 = vadd.f32 %v709_v23, %v665_v29  ;;  %v1565_v23 = vld [vmem:[%s2830_s4 + $0x18] sm:$0xff] }
 0x376   :  { %v2490_v4 = vpop.f32.mrf.mxu1  ;;  %vm1741_vm14 = vcmp.ge.f32.partialorder %v1565_v23, %v2485_v60  ;;  %v1974_v60 = vld [vmem:[%s2830_s4 + $0x58] sm:$0xff] }
 0x377   :  { %v755_v0 = vadd.f32 %v754_v37, %v710_v61 }
 0x378   :  { %v787_v1 = vpop.f32.mrf.mxu2  ;;  %v828_v2 = vpop.f32.mrf.mxu3 }
 0x379   :  { %v788_v35 = vadd.f32 %v787_v1, %v737_v22  ;;  %v1981_v22 = vld [vmem:[%s2830_s4 + $0x90] sm:$0xff] }
 0x37a   :  { %v1780_v34 = vmul.f32 %v1981_v22, %v2536_v12 }
 0x37b   :  { %v2500_v10 = vadd.f32 %v824_v15, %v788_v35  ;;  %v2562_v35 = vsel %vm1741_vm14, %v1565_v23, 0.0 }
 0x37c   :  { %v2509_v3 = vpop.f32.mrf.mxu0 }
 0x37d   :  { %v1746_v16 = vadd.f32 %v1971_v5, %v2500_v10 }
 0x37e   :  { %v2521_v20 = vpop.f32.mrf.mxu1 }
 0x37f   :  { %v1750_v47 = vmul.f32 %v1746_v16, %v2498_v9 }
 0x380   :  { %v791_v63 = vpop.f32.mrf.mxu2  ;;  %v832_v21 = vpop.f32.mrf.mxu3 }
 0x381   :  { %v1782_v6 = vsub.f32 %v1750_v47, %v1778_v18  ;;  %v792_v25 = vadd.f32 %v791_v63, %v743_v48 }
 0x383   :  { %v1786_v33 = vand.u32 2147483647, %v1782_v6  ;;  %v2519_v38 = vadd.f32 %v828_v2, %v792_v25  ;;  %v1982_v2 = vld [vmem:[%s2830_s4 + $0x98] sm:$0xff] }
 0x384   :  { %v2543_v37 = vpop.f32.mrf.mxu0 }
 0x385   :  { %v1747_v17 = vadd.f32 %v1972_v26, %v2519_v38  ;;  %v1794_v44 = vmul.f32 0.5, %v1786_v33  ;;  %v1991_v54 = vadd.f32 -0.5, %v1786_v33  ;;  %vm1790_vm1 = vcmp.lt.f32.partialorder %v1786_v33, 1.0 }
 0x386   :  { %v2547_v7 = vpop.f32.mrf.mxu1  ;;  %v964_v26 = vadd.f32 %v2476_v56, %v899_v13 }
 0x387   :  { %v1751_v43 = vmul.f32 %v1747_v17, %v2517_v57  ;;  %v1798_v24 = vmul.f32 %v1794_v44, %v1786_v33 }
 0x388   :  { %v795_v19 = vpop.f32.mrf.mxu2  ;;  %v836_v39 = vpop.f32.mrf.mxu3 }
 0x389   :  { %v1783_v45 = vsub.f32 %v1751_v43, %v1779_v42  ;;  %v796_v46 = vadd.f32 %v795_v19, %v749_v58  ;;  %v1806_v11 = vsel %vm1790_vm1, %v1798_v24, %v1991_v54 }
 0x38a   :  { %v1810_v5 = vsel %vm1719_vm15, %v1806_v11, 0.0 }
 0x38b   :  { %v1787_v50 = vand.u32 2147483647, %v1783_v45  ;;  %v2538_v52 = vadd.f32 %v832_v21, %v796_v46  ;;  %v1781_v21 = vmul.f32 %v1982_v2, %v2562_v35  ;;  %v907_v45 = vadd.f32 %v2553_v55, %v2487_v62 }
 0x38c   :  { %v1098_v25 = vpop.f32.mrf.mxu0 }
 0x38d   :  { %v1748_v48 = vadd.f32 %v1973_v49, %v2538_v52  ;;  %v1795_v53 = vmul.f32 0.5, %v1787_v50  ;;  %v1992_v15 = vadd.f32 -0.5, %v1787_v50  ;;  %vm1791_vm2 = vcmp.lt.f32.partialorder %v1787_v50, 1.0 }
 0x38e   :  { %v1135_v17 = vpop.f32.mrf.mxu1  ;;  %v968_v23 = vadd.f32 %v2490_v4, %v907_v45 }
 0x38f   :  { %v1752_v58 = vmul.f32 %v1748_v48, %v2536_v12  ;;  %v1799_v30 = vmul.f32 %v1795_v53, %v1787_v50 }
 0x390   :  { %v799_v29 = vpop.f32.mrf.mxu2  ;;  %v1047_v47 = vpop.f32.mrf.mxu3 }
 0x391   :  { %v1784_v59 = vsub.f32 %v1752_v58, %v1780_v34  ;;  %v800_v61 = vadd.f32 %v799_v29, %v755_v0  ;;  %v1807_v1 = vsel %vm1791_vm2, %v1799_v30, %v1992_v15  ;;  %v915_v29 = vadd.f32 %v2553_v55, %v2509_v3 }
 0x392   :  { %v1811_v8 = vsel %vm1719_vm15, %v1807_v1, 0.0 }
 0x393   :  { %v1788_v16 = vand.u32 2147483647, %v1784_v59  ;;  %v2568_v0 = vadd.f32 %v836_v39, %v800_v61  ;;  %v1812_v18 = vadd.f32 %v1811_v8, %v1810_v5  ;;  %v972_v1 = vadd.f32 %v2521_v20, %v915_v29 }
 0x394   :  { %v1102_v53 = vpop.f32.mrf.mxu0 }
 0x395   :  { %v1749_v63 = vadd.f32 %v1974_v60, %v2568_v0  ;;  %v1796_v6 = vmul.f32 0.5, %v1788_v16  ;;  %v1993_v41 = vadd.f32 -0.5, %v1788_v16  ;;  %vm1792_vm3 = vcmp.lt.f32.partialorder %v1788_v16, 1.0 }
 0x396   :  { %v1139_v11 = vpop.f32.mrf.mxu1 }
 0x397   :  { %v1753_v28 = vmul.f32 %v1749_v63, %v2562_v35  ;;  %v1800_v33 = vmul.f32 %v1796_v6, %v1788_v16 }
 0x398   :  { %v1005_v42 = vpop.f32.mrf.mxu2  ;;  %v1053_v50 = vpop.f32.mrf.mxu3 }
 0x399   :  { %v1785_v51 = vsub.f32 %v1753_v28, %v1781_v21  ;;  %v1006_v43 = vadd.f32 %v1005_v42, %v964_v26  ;;  %v1808_v44 = vsel %vm1792_vm3, %v1800_v33, %v1993_v41 }
 0x39a   :  { %v1813_v19 = vsel %vm1719_vm15, %v1808_v44, 0.0 }
 0x39b   :  { %v1789_v46 = vand.u32 2147483647, %v1785_v51  ;;  %v1048_v49 = vadd.f32 %v1047_v47, %v1006_v43  ;;  %v1814_v22 = vadd.f32 %v1813_v19, %v1812_v18  ;;  %v923_v18 = vadd.f32 %v2553_v55, %v2543_v37 }
 0x39c   :  { %v1106_v16 = vpop.f32.mrf.mxu0 }
 0x39d   :  { %v1099_v39 = vadd.f32 %v1098_v25, %v1048_v49  ;;  %v1797_v56 = vmul.f32 0.5, %v1789_v46  ;;  %v1994_v34 = vadd.f32 -0.5, %v1789_v46  ;;  %vm1793_vm4 = vcmp.lt.f32.partialorder %v1789_v46, 1.0 }
 0x39e   :  { %v1143_v63 = vpop.f32.mrf.mxu1  ;;  %v976_v21 = vadd.f32 %v2547_v7, %v923_v18  ;;  %v2648_v18 = vld [vmem:[%s2827_s1 + $0x6] ss:$0 sm:$0xff] }
 0x39f   :  { %v1136_v24 = vadd.f32 %v1135_v17, %v1099_v39  ;;  %v1801_v48 = vmul.f32 %v1797_v56, %v1789_v46 }
 0x3a0   :  { %v1010_v54 = vpop.f32.mrf.mxu2  ;;  %v1059_v2 = vpop.f32.mrf.mxu3 }
 0x3a1   :  { %v1011_v58 = vadd.f32 %v1010_v54, %v968_v23  ;;  %v1150_v30 = vsel %vm35_vm0, %v1136_v24, 0.0  ;;  %v1809_v15 = vsel %vm1793_vm4, %v1801_v48, %v1994_v34 }
 0x3a2   :  { %1151 = vadd.xlane.f32.xlu1 %v1150_v30  ;;  %v1815_v62 = vsel %vm1719_vm15, %v1809_v15, 0.0 }
 0x3a3   :  { %v1054_v59 = vadd.f32 %v1053_v50, %v1011_v58  ;;  %v2582_v61 = vadd.f32 %v1815_v62, %v1814_v22 }
 0x3a4   :  { %v1110_v41 = vpop.f32.mrf.mxu0 }
 0x3a5   :  { %v1103_v4 = vadd.f32 %v1102_v53, %v1054_v59 }
 0x3a6   :  { %v1147_v42 = vpop.f32.mrf.mxu1 }
 0x3a7   :  { %v1140_v60 = vadd.f32 %v1139_v11, %v1103_v4 }
 0x3a8   :  { %v1015_v5 = vpop.f32.mrf.mxu2  ;;  %v1065_v28 = vpop.f32.mrf.mxu3 }
 0x3a9   :  { %v1016_v8 = vadd.f32 %v1015_v5, %v972_v1  ;;  %v1153_v13 = vsel %vm35_vm0, %v1140_v60, 0.0 }
 0x3aa   :  { %1154 = vadd.xlane.f32.xlu2 %v1153_v13 }
 0x3ab   :  { %v1060_v47 = vadd.f32 %v1059_v2, %v1016_v8 }
 0x3ad   :  { %v1107_v3 = vadd.f32 %v1106_v16, %v1060_v47 }
 0x3af   :  { %v1144_v6 = vadd.f32 %v1143_v63, %v1107_v3  ;;  %v2653_v3 = vld [vmem:[%s2827_s1 + $0x7] ss:$0 sm:$0xff] }
 0x3b0   :  { %v1020_v25 = vpop.f32.mrf.mxu2 }
 0x3b1   :  { %v1021_v26 = vadd.f32 %v1020_v25, %v976_v21  ;;  %v1156_v20 = vsel %vm35_vm0, %v1144_v6, 0.0 }
 0x3b2   :  { %1157 = vadd.xlane.f32.xlu0 %v1156_v20 }
 0x3b3   :  { %v1066_v33 = vadd.f32 %v1065_v28, %v1021_v26 }
 0x3b5   :  { %v1111_v17 = vadd.f32 %v1110_v41, %v1066_v33 }
 0x3b7   :  { %v1148_v51 = vadd.f32 %v1147_v42, %v1111_v17 }
 0x3b9   :  { %v1159_v43 = vsel %vm35_vm0, %v1148_v51, 0.0 }
 0x3ba   :  { %1160 = vadd.xlane.f32.xlu1 %v1159_v43 }
 0x3c6   :  { %1262 = vrot.lane.b32.xlu0 %v2293_v27, %s2125_s29 }
 0x415   :  { %v1152_v37 = vpop.xlane.xlu1 %1151 }
 0x416   :  { %v1162_v7 = vmul.f32 %v1152_v37, %v2191_v14 }
 0x418   :  { %v2594_v55 = vsub.f32 %v1136_v24, %v1162_v7 }
 0x41a   :  { %v1170_v44 = vmul.f32 %v2594_v55, %v2594_v55 }
 0x41c   :  { %v1174_v19 = vsel %vm35_vm0, %v1170_v44, 0.0 }
 0x41d   :  { %v1155_v45 = vpop.xlane.xlu2 %1154  ;;  %1175 = vadd.xlane.f32.xlu2 %v1174_v19 }
 0x41e   :  { %v1163_v46 = vmul.f32 %v1155_v45, %v2191_v14 }
 0x420   :  { %v2600_v49 = vsub.f32 %v1140_v60, %v1163_v46 }
 0x422   :  { %v1171_v22 = vmul.f32 %v2600_v49, %v2600_v49 }
 0x424   :  { %v1177_v27 = vsel %vm35_vm0, %v1171_v22, 0.0 }
 0x425   :  { %v1158_v39 = vpop.xlane.xlu0 %1157  ;;  %1178 = vadd.xlane.f32.xlu0 %v1177_v27  ;;  %v1976_v27 = vld [vmem:[%s2830_s4 + $0x68] sm:$0xff] }
 0x426   :  { %v1164_v56 = vmul.f32 %v1158_v39, %v2191_v14 }
 0x428   :  { %v2606_v50 = vsub.f32 %v1144_v6, %v1164_v56 }
 0x42a   :  { %v1172_v23 = vmul.f32 %v2606_v50, %v2606_v50 }
 0x42c   :  { %v1180_v24 = vsel %vm35_vm0, %v1172_v23, 0.0 }
 0x42d   :  { %1181 = vadd.xlane.f32.xlu1 %v1180_v24  ;;  %v1161_v48 = vpop.xlane.xlu1 %1160 }
 0x42e   :  { %v1165_v34 = vmul.f32 %v1161_v48, %v2191_v14 }
 0x430   :  { %v2612_v53 = vsub.f32 %v1148_v51, %v1165_v34 }
 0x432   :  { %v1173_v54 = vmul.f32 %v2612_v53, %v2612_v53 }
 0x434   :  { %v1183_v58 = vsel %vm35_vm0, %v1173_v54, 0.0 }
 0x435   :  { %1184 = vadd.xlane.f32.xlu2 %v1183_v58  ;;  %v1984_v58 = vld [vmem:[%s2830_s4 + $0xa8] sm:$0xff] }
 0x438   :  { %v1263_v30 = vpop.permute.xlu0 %1262 }
 0x439   :  { %1256 = vrot.lane.b32.xlu0 %v2313_v40, %s2125_s29  ;;  %v2619_v15 = vand.u32 4294901760, %v1263_v30 }
 0x43b   :  { %v2622_v11 = vsub.f32 %v1263_v30, %v2619_v15  ;;  %1297 = vmatpush.msra.mxu2 %v2619_v15  ;;  %1448 = vmatpush.msrb.mxu1 %v2619_v15 }
 0x43d   :  { %v1351_v62 = vand.u32 4294901760, %v2622_v11  ;;  %1404 = vmatpush.msrb.mxu0 %v2622_v11 }
 0x43f   :  { %v1352_v40 = vsub.f32 %v2622_v11, %v1351_v62 }
 0x441   :  { %1760 = vrot.lane.b32.xlu0 %v2519_v38, %s2126_s30  ;;  %v1353_v29 = vand.u32 4294901760, %v1352_v40 }
 0x443   :  { %1354 = vmatpush.msra.mxu3 %v1353_v29 }
 0x446   :  { %1260 = vrot.lane.b32.xlu1 %v2299_v32, %s2125_s29 }
 0x44d   :  { %1258 = vrot.lane.b32.xlu2 %v2306_v36, %s2125_s29 }
 0x44e   :  { %1758 = vrot.lane.b32.xlu1 %v2500_v10, %s2126_s30 }
 0x455   :  { %1269 = vrot.lane.b32.xlu2 %v2469_v31, %s2125_s29 }
 0x456   :  { %1764 = vrot.lane.b32.xlu1 %v2568_v0, %s2126_s30 }
 0x45d   :  { %1762 = vrot.lane.b32.xlu2 %v2538_v52, %s2126_s30 }
 0x486   :  { %1817 = vadd.xlane.f32.xlu2 %v2582_v61 }
 0x490   :  { %v1176_v38 = vpop.xlane.xlu2 %1175 }
 0x491   :  { %v1186_v59 = vmul.f32 %v1176_v38, %v2191_v14 }
 0x493   :  { %v1190_v32 = vadd.f32 1e-05, %v1186_v59 }
 0x495   :  { %2046 = vrsqrt.f32 %v1190_v32  ;;  %vm1200_vm6 = vweird.f32 %v1190_v32 }
 0x498   :  { %v1179_v4 = vpop.xlane.xlu0 %1178 }
 0x499   :  { %v1187_v1 = vmul.f32 %v1179_v4, %v2191_v14 }
 0x49b   :  { %v2047_v36 = vpop.eup %2046  ;;  %v1191_v60 = vadd.f32 1e-05, %v1187_v1  ;;  %v1827_v1 = vmul.f32 %v1984_v58, %v2517_v57 }
 0x49c   :  { %v1195_v10 = vmul.f32 %v2047_v36, %v1190_v32  ;;  %vm1201_vm5 = vweird.f32 %v2047_v36 }
 0x49d   :  { %2048 = vrsqrt.f32 %v1191_v60  ;;  %vm1202_vm7 = vmor %vm1200_vm6, %vm1201_vm5  ;;  %vm1210_vm9 = vweird.f32 %v1191_v60 }
 0x49e   :  { %v1196_v2 = vmul.f32 %v2047_v36, %v1195_v10 }
 0x4a0   :  { %v1197_v31 = vmul.f32 0.5, %v1196_v2  ;;  %v1182_v5 = vpop.xlane.xlu1 %1181 }
 0x4a1   :  { %v1188_v0 = vmul.f32 %v1182_v5, %v2191_v14 }
 0x4a2   :  { %v1198_v52 = vsub.f32 1.5, %v1197_v31 }
 0x4a3   :  { %v2049_v61 = vpop.eup %2048  ;;  %v1192_v8 = vadd.f32 1e-05, %v1188_v0 }
 0x4a4   :  { %v1199_v13 = vmul.f32 %v2047_v36, %v1198_v52  ;;  %v1205_v16 = vmul.f32 %v2049_v61, %v1191_v60  ;;  %vm1211_vm8 = vweird.f32 %v2049_v61 }
 0x4a5   :  { %2050 = vrsqrt.f32 %v1192_v8  ;;  %vm1212_vm10 = vmor %vm1210_vm9, %vm1211_vm8  ;;  %vm1220_vm12 = vweird.f32 %v1192_v8 }
 0x4a6   :  { %v1203_v47 = vsel %vm1202_vm7, %v2047_v36, %v1199_v13  ;;  %v1206_v63 = vmul.f32 %v2049_v61, %v1205_v16 }
 0x4a7   :  { %v1234_v21 = vmul.f32 %v1203_v47, %v2594_v55 }
 0x4a8   :  { %v1207_v6 = vmul.f32 0.5, %v1206_v63  ;;  %v1185_v25 = vpop.xlane.xlu2 %1184 }
 0x4a9   :  { %v1239_v26 = vmul.f32 %v2648_v18, %v1234_v21  ;;  %v1189_v20 = vmul.f32 %v1185_v25, %v2191_v14  ;;  %v1983_v25 = vld [vmem:[%s2830_s4 + $0xa0] sm:$0xff] }
 0x4aa   :  { %v1208_v28 = vsub.f32 1.5, %v1207_v6 }
 0x4ab   :  { %v2051_v33 = vpop.eup %2050  ;;  %v1244_v41 = vadd.f32 %v2653_v3, %v1239_v26  ;;  %v1193_v17 = vadd.f32 1e-05, %v1189_v20  ;;  %v1257_v42 = vpop.permute.xlu0 %1256  ;;  %v1985_v26 = vld [vmem:[%s2830_s4 + $0xb0] sm:$0xff] }
 0x4ac   :  { %v1209_v51 = vmul.f32 %v2049_v61, %v1208_v28  ;;  %v1215_v43 = vmul.f32 %v2051_v33, %v1192_v8  ;;  %vm1221_vm11 = vweird.f32 %v2051_v33  ;;  %v2676_v40 = vand.u32 4294901760, %v1257_v42 }
 0x4ad   :  { %v1248_v37 = vmax.f32 %v1244_v41, 0.0  ;;  %2052 = vrsqrt.f32 %v1193_v17  ;;  %vm1222_vm13 = vmor %vm1220_vm12, %vm1221_vm11  ;;  %vm1230_vm1 = vweird.f32 %v1193_v17 }
 0x4ae   :  { %v1213_v7 = vsel %vm1212_vm10, %v2049_v61, %v1209_v51  ;;  %v1216_v55 = vmul.f32 %v2051_v33, %v1215_v43  ;;  %v2692_v61 = vsub.f32 %v1257_v42, %v2676_v40  ;;  %v1975_v42 = vld [vmem:[%s2830_s4 + $0x60] sm:$0xff]  ;;  %v1977_v51 = vld [vmem:[%s2830_s4 + $0x70] sm:$0xff] }
 0x4af   :  { %v1235_v44 = vmul.f32 %v1213_v7, %v2600_v49  ;;  %v1273_v19 = vsel %vm35_vm0, %v1248_v37, 0  ;;  %v1826_v7 = vmul.f32 %v1983_v25, %v2498_v9 }
 0x4b0   :  { %v1217_v14 = vmul.f32 0.5, %v1216_v55  ;;  %v1259_v45 = vpop.permute.xlu2 %1258  ;;  %v2661_v46 = vand.u32 4294901760, %v1273_v19  ;;  %v1369_v41 = vand.u32 4294901760, %v2692_v61 }
 0x4b1   :  { %v1240_v22 = vmul.f32 %v2648_v18, %v1235_v44  ;;  %v2671_v54 = vand.u32 4294901760, %v1259_v45 }
 0x4b2   :  { %v1218_v39 = vsub.f32 1.5, %v1217_v14  ;;  %v2668_v56 = vsub.f32 %v1273_v19, %v2661_v46 }
 0x4b3   :  { %v2053_v23 = vpop.eup %2052  ;;  %v1761_v49 = vpop.permute.xlu0 %1760  ;;  %v1245_v24 = vadd.f32 %v2653_v3, %v1240_v22  ;;  %v2683_v10 = vsub.f32 %v1259_v45, %v2671_v54  ;;  %v1828_v45 = vmul.f32 %v1985_v26, %v2536_v12 }
 0x4b4   :  { %v1219_v48 = vmul.f32 %v2051_v33, %v1218_v39  ;;  %v1225_v34 = vmul.f32 %v2053_v23, %v1193_v17  ;;  %v1771_v30 = vadd.f32 %v1976_v27, %v1761_v49  ;;  %v1306_v32 = vand.u32 4294901760, %v2668_v56 }
 0x4b5   :  { %v1249_v29 = vmax.f32 %v1245_v24, 0.0  ;;  %vm1231_vm14 = vweird.f32 %v2053_v23  ;;  %v1363_v21 = vand.u32 4294901760, %v2683_v10 }
 0x4b6   :  { %v1223_v38 = vsel %vm1222_vm13, %v2051_v33, %v1219_v48  ;;  %v1226_v59 = vmul.f32 %v2053_v23, %v1225_v34  ;;  %v1775_v2 = vmul.f32 %v1771_v30, %v2517_v57  ;;  %v1307_v13 = vsub.f32 %v2668_v56, %v1306_v32  ;;  %vm1232_vm2 = vmor %vm1230_vm1, %vm1231_vm14 }
 0x4b7   :  { %v1236_v4 = vmul.f32 %v1223_v38, %v2606_v50  ;;  %v1276_v36 = vsel %vm35_vm0, %v1249_v29, 0  ;;  %v1370_v48 = vsub.f32 %v2692_v61, %v1369_v41 }
 0x4b8   :  { %v1227_v60 = vmul.f32 0.5, %v1226_v59  ;;  %v2686_v31 = vpop.permute.xlu2 %1269  ;;  %v1261_v5 = vpop.permute.xlu1 %1260  ;;  %v2688_v0 = vand.u32 4294901760, %v1276_v36  ;;  %v1831_v6 = vsub.f32 %v1775_v2, %v1827_v1  ;;  %v1308_v17 = vand.u32 4294901760, %v1307_v13 }
 0x4b9   :  { %v1241_v52 = vmul.f32 %v2648_v18, %v1236_v4  ;;  %v2694_v50 = vand.u32 4294901760, %v1261_v5  ;;  %v1371_v4 = vand.u32 4294901760, %v1370_v48 }
 0x4ba   :  { %v1228_v8 = vsub.f32 1.5, %v1227_v60  ;;  %v2698_v16 = vsub.f32 %v1276_v36, %v2688_v0  ;;  %v2726_v19 = vand.u32 2147483647, %v1831_v6 }
 0x4bb   :  { %v1356_v57 = vsub.f32 %v1261_v5, %v2694_v50  ;;  %1299 = vmatpush.msra.mxu2 %v2694_v50  ;;  %1450 = vmatpush.msrb.mxu1 %v2694_v50  ;;  %v1246_v47 = vadd.f32 %v2653_v3, %v1241_v52 }
 0x4bc   :  { %v1229_v63 = vmul.f32 %v2053_v23, %v1228_v8  ;;  %v1314_v43 = vand.u32 4294901760, %v2698_v16  ;;  %v1843_v29 = vmul.f32 0.5, %v2726_v19  ;;  %v1996_v25 = vadd.f32 -0.5, %v2726_v19 }
 0x4bd   :  { %1301 = vmatpush.msra.mxu2 %v2671_v54  ;;  %1407 = vmatpush.msrb.mxu0 %v1356_v57  ;;  %v1357_v20 = vand.u32 4294901760, %v1356_v57  ;;  %v1250_v28 = vmax.f32 %v1246_v47, 0.0  ;;  %vm1839_vm3 = vcmp.lt.f32.partialorder %v2726_v19, 1.0 }
 0x4be   :  { %v1233_v33 = vsel %vm1232_vm2, %v2053_v23, %v1229_v63  ;;  %1452 = vmatpush.msrb.mxu1 %v2671_v54  ;;  %v1315_v34 = vsub.f32 %v2698_v16, %v1314_v43  ;;  %v1847_v8 = vmul.f32 %v1843_v29, %v2726_v19 }
 0x4bf   :  { %v1237_v37 = vmul.f32 %v1233_v33, %v2612_v53  ;;  %1303 = vmatpush.msra.mxu2 %v2676_v40  ;;  %1410 = vmatpush.msrb.mxu0 %v2683_v10  ;;  %v1358_v55 = vsub.f32 %v1356_v57, %v1357_v20  ;;  %v1279_v44 = vsel %vm35_vm0, %v1250_v28, 0  ;;  %v1364_v53 = vsub.f32 %v2683_v10, %v1363_v21 }
 0x4c0   :  { %1454 = vmatpush.msrb.mxu1 %v2676_v40  ;;  %1309 = vmatmul.f32.vlgmr.msra.gmra.mxu2 %v1308_v17  ;;  %v1759_v14 = vpop.permute.xlu1 %1758  ;;  %v1763_v22 = vpop.permute.xlu2 %1762  ;;  %v2731_v27 = vand.u32 4294901760, %v1279_v44  ;;  %v1316_v1 = vand.u32 4294901760, %v1315_v34  ;;  %v1855_v28 = vsel %vm1839_vm3, %v1847_v8, %v1996_v25 }
 0x4c1   :  { %v1242_v39 = vmul.f32 %v2648_v18, %v1237_v37  ;;  %1458 = vmatmul.f32.vlgmr.msrb.gmra.mxu1 %v1306_v32  ;;  %1495 = vmatpush.msrb.mxu2 %v1351_v62  ;;  %v1770_v23 = vadd.f32 %v1975_v42, %v1759_v14  ;;  %v1772_v49 = vadd.f32 %v1977_v51, %v1763_v22  ;;  %v1359_v24 = vand.u32 4294901760, %v1358_v55 }
 0x4c2   :  { %1413 = vmatpush.msrb.mxu0 %v2692_v61  ;;  %v2740_v58 = vsub.f32 %v1279_v44, %v2731_v27  ;;  %v1365_v62 = vand.u32 4294901760, %v1364_v53 }
 0x4c3   :  { %v1774_v30 = vmul.f32 %v1770_v23, %v2498_v9  ;;  %v1776_v18 = vmul.f32 %v1772_v49, %v2536_v12  ;;  %1416 = vmatmul.f32.vlgmr.msrb.gmra.mxu0 %v2668_v56  ;;  %1499 = vmatpush.msrb.mxu2 %v1357_v20  ;;  %v1247_v11 = vadd.f32 %v2653_v3, %v1242_v39  ;;  %v1978_v9 = vld [vmem:[%s2830_s4 + $0x78] sm:$0xff] }
 0x4c4   :  { %1360 = vmatpush.msra.mxu3 %v1359_v24  ;;  %v1986_v12 = vld [vmem:[%s2830_s4 + $0xb8] sm:$0xff]  ;;  %v1322_v3 = vand.u32 4294901760, %v2740_v58 }
 0x4c5   :  { %v1830_v38 = vsub.f32 %v1774_v30, %v1826_v7  ;;  %v1832_v59 = vsub.f32 %v1776_v18, %v1828_v45  ;;  %1503 = vmatpush.msrb.mxu2 %v1363_v21  ;;  %v1251_v32 = vmax.f32 %v1247_v11, 0.0  ;;  %v1829_v52 = vmul.f32 %v1986_v12, %v2562_v35 }
 0x4c6   :  { %1366 = vmatpush.msra.mxu3 %v1365_v62  ;;  %v1323_v13 = vsub.f32 %v2740_v58, %v1322_v3 }
 0x4c7   :  { %v1834_v56 = vand.u32 2147483647, %v1830_v38  ;;  %v1836_v36 = vand.u32 2147483647, %v1832_v59  ;;  %1507 = vmatpush.msrb.mxu2 %v1369_v41  ;;  %v1282_v60 = vsel %vm35_vm0, %v1251_v32, 0 }
 0x4c8   :  { %1372 = vmatpush.msra.mxu3 %v1371_v4  ;;  %1317 = vmatmul.f32.gmra.mxu2 %v1316_v1  ;;  %v1765_v10 = vpop.permute.xlu1 %1764  ;;  %v1328_v2 = vand.u32 4294901760, %v1282_v60  ;;  %v1324_v33 = vand.u32 4294901760, %v1323_v13 }
 0x4c9   :  { %v1842_v5 = vmul.f32 0.5, %v1834_v56  ;;  %1374 = vmatmul.f32.vlgmr.msra.gmra.mxu3 %v2661_v46  ;;  %1464 = vmatmul.f32.gmra.mxu1 %v1314_v43  ;;  %v1773_v61 = vadd.f32 %v1978_v9, %v1765_v10  ;;  %v1844_v47 = vmul.f32 0.5, %v1836_v36  ;;  %v1995_v6 = vadd.f32 -0.5, %v1834_v56 }
 0x4ca   :  { %1538 = vmatpush.msrb.mxu3 %v2619_v15  ;;  %v1329_v57 = vsub.f32 %v1282_v60, %v1328_v2  ;;  %vm1838_vm0 = vcmp.lt.f32.partialorder %v1834_v56, 1.0  ;;  %v1997_v17 = vadd.f32 -0.5, %v1836_v36  ;;  %vm1840_vm4 = vcmp.lt.f32.partialorder %v1836_v36, 1.0 }
 0x4cb   :  { %v1777_v63 = vmul.f32 %v1773_v61, %v2562_v35  ;;  %1421 = vmatmul.f32.gmra.mxu0 %v2698_v16  ;;  %v1846_v21 = vmul.f32 %v1842_v5, %v1834_v56  ;;  %v1848_v20 = vmul.f32 %v1844_v47, %v1836_v36 }
 0x4cc   :  { %1540 = vmatpush.msrb.mxu3 %v2694_v50  ;;  %v1330_v41 = vand.u32 4294901760, %v1329_v57  ;;  %v1859_v50 = vsel %vm1719_vm15, %v1855_v28, 0.0 }
 0x4cd   :  { %v1833_v26 = vsub.f32 %v1777_v63, %v1829_v52  ;;  %v1854_v15 = vsel %vm1838_vm0, %v1846_v21, %v1995_v6  ;;  %v1856_v51 = vsel %vm1840_vm4, %v1848_v20, %v1997_v17 }
 0x4ce   :  { %1542 = vmatpush.msrb.mxu3 %v2671_v54  ;;  %v1858_v35 = vsel %vm1719_vm15, %v1854_v15, 0.0  ;;  %v1331_v37 = vsub.f32 %v1329_v57, %v1330_v41  ;;  %v1861_v55 = vsel %vm1719_vm15, %v1856_v51, 0.0 }
 0x4cf   :  { %v1837_v16 = vand.u32 2147483647, %v1833_v26  ;;  %v1860_v43 = vadd.f32 %v1859_v50, %v1858_v35 }
 0x4d0   :  { %1544 = vmatpush.msrb.mxu3 %v2676_v40  ;;  %1325 = vmatmul.f32.gmra.mxu2 %v1324_v33  ;;  %v1332_v19 = vand.u32 4294901760, %v1331_v37 }
 0x4d1   :  { %1378 = vmatmul.f32.gmra.mxu3 %v2688_v0  ;;  %1470 = vmatmul.f32.gmra.mxu1 %v1322_v3  ;;  %v1845_v42 = vmul.f32 0.5, %v1837_v16  ;;  %v1998_v7 = vadd.f32 -0.5, %v1837_v16  ;;  %vm1841_vm5 = vcmp.lt.f32.partialorder %v1837_v16, 1.0  ;;  %v1862_v40 = vadd.f32 %v1861_v55, %v1860_v43 }
 0x4d3   :  { %1426 = vmatmul.f32.gmra.mxu0 %v2740_v58  ;;  %v1849_v54 = vmul.f32 %v1845_v42, %v1837_v16 }
 0x4d5   :  { %v1857_v44 = vsel %vm1841_vm5, %v1849_v54, %v1998_v7 }
 0x4d6   :  { %v1863_v14 = vsel %vm1719_vm15, %v1857_v44, 0.0 }
 0x4d7   :  { %v1864_v45 = vadd.f32 %v1863_v14, %v1862_v40 }
 0x4d8   :  { %1333 = vmatmul.f32.gmra.mxu2 %v1332_v19 }
 0x4d9   :  { %1382 = vmatmul.f32.gmra.mxu3 %v2731_v27  ;;  %1476 = vmatmul.f32.gmra.mxu1 %v1330_v41 }
 0x4da   :  { %1865 = vadd.xlane.f32.xlu1 %v1864_v45 }
 0x4db   :  { %1431 = vmatmul.f32.gmra.mxu0 %v1329_v57 }
 0x4e0   :  { %1509 = vmatmul.f32.vlgmr.msrb.gmra.mxu2 %v2661_v46 }
 0x4e1   :  { %1386 = vmatmul.f32.gmra.mxu3 %v1328_v2 }
 0x4e8   :  { %1513 = vmatmul.f32.gmra.mxu2 %v2688_v0 }
 0x4e9   :  { %1546 = vmatmul.f32.vlgmr.msrb.gmra.mxu3 %v2661_v46 }
 0x4f0   :  { %1517 = vmatmul.f32.gmra.mxu2 %v2731_v27 }
 0x4f1   :  { %1550 = vmatmul.f32.gmra.mxu3 %v2688_v0 }
 0x4f8   :  { %1521 = vmatmul.f32.gmra.mxu2 %v1328_v2 }
 0x4f9   :  { %1554 = vmatmul.f32.gmra.mxu3 %v2731_v27 }
 0x501   :  { %1558 = vmatmul.f32.gmra.mxu3 %v1328_v2 }
 0x53e   :  { %v1459_v30 = vpop.f32.mrf.mxu1 }
 0x540   :  { %v1417_v34 = vpop.f32.mrf.mxu0 }
 0x543   :  { %v1310_v22 = vpop.f32.mrf.mxu2 }
 0x544   :  { %v1311_v58 = vadd.f32 %v1310_v22, %v2686_v31 }
 0x546   :  { %v1465_v59 = vpop.f32.mrf.mxu1 }
 0x548   :  { %v1422_v29 = vpop.f32.mrf.mxu0 }
 0x54b   :  { %v1318_v53 = vpop.f32.mrf.mxu2 }
 0x54c   :  { %v1375_v39 = vpop.f32.mrf.mxu3  ;;  %v1319_v0 = vadd.f32 %v1318_v53, %v2686_v31 }
 0x54d   :  { %v1376_v46 = vadd.f32 %v1375_v39, %v1311_v58 }
 0x54e   :  { %v1471_v8 = vpop.f32.mrf.mxu1 }
 0x54f   :  { %v1418_v62 = vadd.f32 %v1417_v34, %v1376_v46 }
 0x550   :  { %v1427_v10 = vpop.f32.mrf.mxu0 }
 0x551   :  { %v1460_v38 = vadd.f32 %v1459_v30, %v1418_v62 }
 0x553   :  { %v1326_v23 = vpop.f32.mrf.mxu2 }
 0x554   :  { %v1379_v49 = vpop.f32.mrf.mxu3  ;;  %v1327_v3 = vadd.f32 %v1326_v23, %v2686_v31 }
 0x555   :  { %v1380_v27 = vadd.f32 %v1379_v49, %v1319_v0 }
 0x556   :  { %v1477_v17 = vpop.f32.mrf.mxu1 }
 0x557   :  { %v1423_v9 = vadd.f32 %v1422_v29, %v1380_v27 }
 0x558   :  { %v1432_v20 = vpop.f32.mrf.mxu0 }
 0x559   :  { %v1466_v60 = vadd.f32 %v1465_v59, %v1423_v9 }
 0x55b   :  { %v1334_v24 = vpop.f32.mrf.mxu2 }
 0x55c   :  { %v1383_v48 = vpop.f32.mrf.mxu3  ;;  %v1335_v47 = vadd.f32 %v1334_v24, %v2686_v31 }
 0x55d   :  { %v1384_v36 = vadd.f32 %v1383_v48, %v1327_v3  ;;  %v1967_v48 = vld [vmem:[%s2830_s4 + $0x20] sm:$0xff] }
 0x55f   :  { %v1428_v52 = vadd.f32 %v1427_v10, %v1384_v36 }
 0x561   :  { %v1472_v25 = vadd.f32 %v1471_v8, %v1428_v52  ;;  %v1969_v8 = vld [vmem:[%s2830_s4 + $0x30] sm:$0xff] }
 0x563   :  { %v1510_v18 = vpop.f32.mrf.mxu2 }
 0x564   :  { %v1387_v11 = vpop.f32.mrf.mxu3  ;;  %v1511_v32 = vadd.f32 %v1510_v18, %v1460_v38 }
 0x565   :  { %v1388_v6 = vadd.f32 %v1387_v11, %v1335_v47 }
 0x567   :  { %v1433_v28 = vadd.f32 %v1432_v20, %v1388_v6 }
 0x569   :  { %v1478_v43 = vadd.f32 %v1477_v17, %v1433_v28 }
 0x56b   :  { %v1514_v4 = vpop.f32.mrf.mxu2 }
 0x56c   :  { %v1547_v1 = vpop.f32.mrf.mxu3  ;;  %v1515_v2 = vadd.f32 %v1514_v4, %v1466_v60 }
 0x56d   :  { %v1548_v12 = vadd.f32 %v1547_v1, %v1511_v32  ;;  %v1968_v32 = vld [vmem:[%s2830_s4 + $0x28] sm:$0xff] }
 0x56f   :  { %v1987_v56 = vmul.f32 -1.442695, %v1548_v12  ;;  %v2793_v12 = vld [vmem:[%s2832_s6] sm:$0x3] }
 0x571   :  { %2054 = vpow2.f32 %v1987_v56 }
 0x573   :  { %v1518_v13 = vpop.f32.mrf.mxu2 }
 0x574   :  { %v1551_v5 = vpop.f32.mrf.mxu3  ;;  %v1519_v26 = vadd.f32 %v1518_v13, %v1472_v25 }
 0x575   :  { %v1552_v61 = vadd.f32 %v1551_v5, %v1515_v2  ;;  %v1880_v2 = vand.u32 2147483647, %v2793_v12 }
 0x577   :  { %v2055_v57 = vpop.eup %2054  ;;  %v1988_v63 = vmul.f32 -1.442695, %v1552_v61 }
 0x578   :  { %v1603_v21 = vadd.f32 1.0, %v2055_v57 }
 0x579   :  { %2056 = vpow2.f32 %v1988_v63  ;;  %v1881_v63 = vsub.f32 0.0, %v1880_v2  ;;  %v2097_v2 = vld [vmem:[%s2830_s4 + $0x18] sm:$0xff] }
 0x57a   :  { %2058 = vrcp.f32 %v1603_v21  ;;  %v1618_v55 = vand.u32 2147483648, %v1603_v21  ;;  %v1616_v40 = vand.u32 2147483647, %v1603_v21  ;;  %vm1612_vm7 = vweird.f32 %v1603_v21 }
 0x57b   :  { %v1522_v42 = vpop.f32.mrf.mxu2 }
 0x57c   :  { %v1555_v15 = vpop.f32.mrf.mxu3  ;;  %v1523_v37 = vadd.f32 %v1522_v42, %v1478_v43  ;;  %v1619_v23 = vor.u32 1.1754944e-38, %v1618_v55  ;;  %vm1617_vm9 = vcmp.eq.f32.partialorder %v1616_v40, 8.507059e+37 }
 0x57d   :  { %v1556_v33 = vadd.f32 %v1555_v15, %v1519_v26 }
 0x57f   :  { %v2057_v41 = vpop.eup %2056  ;;  %v1989_v35 = vmul.f32 -1.442695, %v1556_v33 }
 0x580   :  { %v2059_v16 = vpop.eup %2058  ;;  %v1604_v50 = vadd.f32 1.0, %v2057_v41 }
 0x581   :  { %v1608_v51 = vmul.f32 %v2059_v16, %v1603_v21  ;;  %2060 = vpow2.f32 %v1989_v35  ;;  %vm1613_vm6 = vweird.f32 %v2059_v16  ;;  %v1882_v35 = vmul.f32 1.442695, %v1881_v63 }
 0x582   :  { %2062 = vrcp.f32 %v1604_v50  ;;  %vm1614_vm8 = vmor %vm1612_vm7, %vm1613_vm6  ;;  %v1633_v30 = vand.u32 2147483648, %v1604_v50  ;;  %v1631_v46 = vand.u32 2147483647, %v1604_v50  ;;  %vm1627_vm11 = vweird.f32 %v1604_v50 }
 0x583   :  { %v1609_v31 = vsub.f32 1.0, %v1608_v51  ;;  %v1970_v51 = vld [vmem:[%s2830_s4 + $0x38] sm:$0xff]  ;;  %vm1888_vm7 = vcmask 1041408  }
 0x584   :  { %v1559_v54 = vpop.f32.mrf.mxu3  ;;  %v1634_v38 = vor.u32 1.1754944e-38, %v1633_v30  ;;  %vm1632_vm13 = vcmp.eq.f32.partialorder %v1631_v46, 8.507059e+37 }
 0x585   :  { %v1610_v7 = vmul.f32 %v2059_v16, %v1609_v31  ;;  %v1560_v44 = vadd.f32 %v1559_v54, %v1523_v37  ;;  %v2094_v54 = vld [vmem:[%s2830_s4 + $0x8] sm:$0xff] }
 0x587   :  { %v2061_v19 = vpop.eup %2060  ;;  %v1611_v14 = vadd.f32 %v2059_v16, %v1610_v7  ;;  %v1990_v45 = vmul.f32 -1.442695, %v1560_v44  ;;  %v1704_v7 = vsub.f32 1.0, %v2094_v54 }
 0x588   :  { %v2063_v22 = vpop.eup %2062  ;;  %v1605_v53 = vadd.f32 1.0, %v2061_v19 }
 0x589   :  { %v1615_v39 = vsel %vm1614_vm8, %v2059_v16, %v1611_v14  ;;  %v1623_v49 = vmul.f32 %v2063_v22, %v1604_v50  ;;  %2064 = vpow2.f32 %v1990_v45  ;;  %vm1628_vm10 = vweird.f32 %v2063_v22 }
 0x58a   :  { %2066 = vrcp.f32 %v1605_v53  ;;  %v1620_v34 = vsel %vm1617_vm9, %v1619_v23, %v1615_v39  ;;  %vm1629_vm12 = vmor %vm1627_vm11, %vm1628_vm10  ;;  %v1648_v3 = vand.u32 2147483648, %v1605_v53  ;;  %v1646_v60 = vand.u32 2147483647, %v1605_v53  ;;  %v2095_v39 = vld [vmem:[%s2830_s4] sm:$0xff] }
 0x58b   :  { %v1624_v24 = vsub.f32 1.0, %v1623_v49  ;;  %v1667_v18 = vmul.f32 %v1967_v48, %v1620_v34  ;;  %vm1642_vm1 = vweird.f32 %v1605_v53  ;;  %v1703_v23 = vsub.f32 1.0, %v2095_v39  ;;  %v2096_v48 = vld [vmem:[%s2830_s4 + $0x10] sm:$0xff] }
 0x58c   :  { %v1649_v61 = vor.u32 1.1754944e-38, %v1648_v3  ;;  %vm1647_vm0 = vcmp.eq.f32.partialorder %v1646_v60, 8.507059e+37  ;;  %v1705_v34 = vsub.f32 1.0, %v2096_v48 }
 0x58d   :  { %v1625_v58 = vmul.f32 %v2063_v22, %v1624_v24  ;;  %v1683_v4 = vsub.f32 1.0, %v1667_v18 }
 0x58f   :  { %v2065_v11 = vpop.eup %2064  ;;  %v1626_v62 = vadd.f32 %v2063_v22, %v1625_v58 }
 0x590   :  { %v2067_v0 = vpop.eup %2066  ;;  %v1606_v29 = vadd.f32 1.0, %v2065_v11 }
 0x591   :  { %v1630_v27 = vsel %vm1629_vm12, %v2063_v22, %v1626_v62  ;;  %v1638_v59 = vmul.f32 %v2067_v0, %v1605_v53  ;;  %vm1643_vm14 = vweird.f32 %v2067_v0 }
 0x592   :  { %2068 = vrcp.f32 %v1606_v29  ;;  %v1635_v9 = vsel %vm1632_vm13, %v1634_v38, %v1630_v27  ;;  %vm1644_vm2 = vmor %vm1642_vm1, %vm1643_vm14  ;;  %v1661_v26 = vand.u32 2147483647, %v1606_v29  ;;  %v1663_v20 = vand.u32 2147483648, %v1606_v29 }
 0x593   :  { %v1639_v1 = vsub.f32 1.0, %v1638_v59  ;;  %v1668_v56 = vmul.f32 %v1968_v32, %v1635_v9  ;;  %2070 = vlog2.f32 %v1683_v4  ;;  %vm1657_vm4 = vweird.f32 %v1606_v29 }
 0x594   :  { %v1664_v42 = vor.u32 1.1754944e-38, %v1663_v20  ;;  %vm1662_vm6 = vcmp.eq.f32.partialorder %v1661_v26, 8.507059e+37 }
 0x595   :  { %v1640_v36 = vmul.f32 %v2067_v0, %v1639_v1  ;;  %v1684_v10 = vsub.f32 1.0, %v1668_v56  ;;  %2072 = vlog2.f32 %v1668_v56 }
 0x597   :  { %v1641_v5 = vadd.f32 %v2067_v0, %v1640_v36  ;;  %2074 = vlog2.f32 %v1684_v10 }
 0x598   :  { %v2069_v52 = vpop.eup %2068  ;;  %2076 = vlog2.f32 %v1667_v18 }
 0x599   :  { %v1653_v13 = vmul.f32 %v2069_v52, %v1606_v29  ;;  %v1645_v57 = vsel %vm1644_vm2, %v2067_v0, %v1641_v5  ;;  %v2071_v25 = vpop.eup %2070  ;;  %vm1658_vm3 = vweird.f32 %v2069_v52  ;;  %v1706_v5 = vsub.f32 1.0, %v2097_v2 }
 0x59a   :  { %v1650_v47 = vsel %vm1647_vm0, %v1649_v61, %v1645_v57  ;;  %vm1659_vm5 = vmor %vm1657_vm4, %vm1658_vm3  ;;  %v1688_v31 = vmul.f32 0.6931472, %v2071_v25  ;;  %v1876_v57 = vld [vmem:[%s2833_s7] sm:$0x3] }
 0x59b   :  { %v1654_v21 = vsub.f32 1.0, %v1653_v13  ;;  %v1669_v6 = vmul.f32 %v1969_v8, %v1650_v47  ;;  %v2073_v15 = vpop.eup %2072 }
 0x59c   :  { %v1674_v43 = vmul.f32 0.6931472, %v2073_v15  ;;  %v1695_v53 = vmax.f32 %v1688_v31, -100.0  ;;  %v1878_v15 = vmul.f32 %v1876_v57, %v2793_v12  ;;  %v1818_v31 = vpop.xlane.xlu2 %1817 }
 0x59d   :  { %v1655_v28 = vmul.f32 %v2069_v52, %v1654_v21  ;;  %2078 = vlog2.f32 %v1669_v6  ;;  %v1685_v33 = vsub.f32 1.0, %v1669_v6  ;;  %v2075_v41 = vpop.eup %2074  ;;  %v1877_v6 = vmax.f32 %v2793_v12, 0.0 }
 0x59e   :  { %v2077_v16 = vpop.eup %2076  ;;  %v1690_v50 = vmul.f32 0.6931472, %v2075_v41  ;;  %v1680_v22 = vmax.f32 %v1674_v43, -100.0  ;;  %v1707_v29 = vmul.f32 %v1703_v23, %v1695_v53  ;;  %v2128_v12 = vmov 128.0  }
 0x59f   :  { %v1656_v17 = vadd.f32 %v2069_v52, %v1655_v28  ;;  %2080 = vlog2.f32 %v1685_v33  ;;  %v1672_v44 = vmul.f32 0.6931472, %v2077_v16 }
 0x5a0   :  { %v1696_v40 = vmax.f32 %v1690_v50, -100.0  ;;  %2082 = vpow2.f32 %v1882_v35  ;;  %v1700_v0 = vmul.f32 %v2094_v54, %v1680_v22  ;;  %v1819_v54 = vrot.slane %v1818_v31, 4 }
 0x5a1   :  { %v1660_v37 = vsel %vm1659_vm5, %v2069_v52, %v1656_v17  ;;  %v1679_v58 = vmax.f32 %v1672_v44, -100.0  ;;  %v1879_v17 = vsub.f32 %v1877_v6, %v1878_v15 }
 0x5a2   :  { %v1665_v55 = vsel %vm1662_vm6, %v1664_v42, %v1660_v37  ;;  %v1708_v18 = vmul.f32 %v1704_v7, %v1696_v40  ;;  %v1866_v37 = vpop.xlane.xlu1 %1865  ;;  %v1820_v44 = vadd.f32 %v1819_v54, %v1818_v31 }
 0x5a3   :  { %v2079_v19 = vpop.eup %2078  ;;  %v1670_v14 = vmul.f32 %v1970_v51, %v1665_v55  ;;  %v1699_v27 = vmul.f32 %v2095_v39, %v1679_v58  ;;  %v1867_v7 = vrot.slane %v1866_v37, 4  ;;  %v2127_v55 = vmov 256.0  }
 0x5a4   :  { %v1676_v45 = vmul.f32 0.6931472, %v2079_v19  ;;  %v1712_v32 = vadd.f32 %v1708_v18, %v1700_v0 }
 0x5a5   :  { %v2081_v49 = vpop.eup %2080  ;;  %2084 = vlog2.f32 %v1670_v14  ;;  %v1686_v24 = vsub.f32 1.0, %v1670_v14  ;;  %v1711_v3 = vadd.f32 %v1707_v29, %v1699_v27  ;;  %v1868_v40 = vadd.f32 %v1867_v7, %v1866_v37 }
 0x5a6   :  { %v1681_v30 = vmax.f32 %v1676_v45, -100.0  ;;  %v1692_v46 = vmul.f32 0.6931472, %v2081_v49  ;;  %v2083_v11 = vpop.eup %2082  ;;  %v1716_v52 = vsub.f32 0.0, %v1712_v32  ;;  %v1821_v14 = vrot.slane %v1820_v44, 2 }
 0x5a7   :  { %2086 = vlog2.f32 %v1686_v24  ;;  %v1884_v1 = vadd.f32 1.0, %v2083_v11  ;;  %v1715_v8 = vsub.f32 0.0, %v1711_v3  ;;  %v1869_v53 = vrot.slane %v1868_v40, 2 }
 0x5a8   :  { %v1697_v62 = vmax.f32 %v1692_v46, -100.0  ;;  %v1701_v38 = vmul.f32 %v2096_v48, %v1681_v30  ;;  %v1721_v21 = vsel %vm1719_vm15, %v1716_v52, 0.0  ;;  %v1822_v24 = vadd.f32 %v1821_v14, %v1820_v44 }
 0x5a9   :  { %2088 = vlog2.f32 %v1884_v1  ;;  %v1720_v26 = vsel %vm1719_vm15, %v1715_v8, 0.0 }
 0x5aa   :  { %v1709_v59 = vmul.f32 %v1705_v34, %v1697_v62  ;;  %v1722_v33 = vadd.f32 %v1721_v21, %v1720_v26  ;;  %2090 = vrcp.f32 %v2127_v55  ;;  %v1870_v34 = vadd.f32 %v1869_v53, %v1868_v40 }
 0x5ab   :  { %v2085_v4 = vpop.eup %2084  ;;  %2092 = vrcp.f32 %v2128_v12  ;;  %v1823_v11 = vrot.slane %v1822_v24, 1 }
 0x5ac   :  { %v1678_v9 = vmul.f32 0.6931472, %v2085_v4  ;;  %v1713_v56 = vadd.f32 %v1709_v59, %v1701_v38  ;;  %v1871_v27 = vrot.slane %v1870_v34, 1 }
 0x5ad   :  { %v2087_v36 = vpop.eup %2086  ;;  %v1824_v4 = vadd.f32 %v1823_v11, %v1822_v24 }
 0x5ae   :  { %v1682_v60 = vmax.f32 %v1678_v9, -100.0  ;;  %v1694_v10 = vmul.f32 0.6931472, %v2087_v36  ;;  %v1717_v13 = vsub.f32 0.0, %v1713_v56  ;;  %v1872_v3 = vadd.f32 %v1871_v27, %v1870_v34 }
 0x5af   :  { %v2089_v28 = vpop.eup %2088 }
 0x5b0   :  { %v1698_v61 = vmax.f32 %v1694_v10, -100.0  ;;  %v1702_v47 = vmul.f32 %v2097_v2, %v1682_v60  ;;  %v1723_v20 = vsel %vm1719_vm15, %v1717_v13, 0.0  ;;  %v1886_v50 = vmul.f32 0.6931472, %v2089_v28  ;;  %v2091_v19 = vpop.eup %2090 }
 0x5b1   :  { %v1724_v35 = vadd.f32 %v1723_v20, %v1722_v33  ;;  %v2093_v22 = vpop.eup %2092  ;;  %v1900_v49 = vmul.f32 256.0, %v2091_v19 }
 0x5b2   :  { %v1710_v63 = vmul.f32 %v1706_v5, %v1698_v61  ;;  %v1887_v51 = vadd.f32 %v1886_v50, %v1879_v17  ;;  %v1909_v48 = vmul.f32 128.0, %v2093_v22  ;;  %vm1913_vm8 = vweird.f32 %v2093_v22 }
 0x5b3   :  { %v1901_v46 = vsub.f32 1.0, %v1900_v49  ;;  %v1929_v61 = vlaneseq }
 0x5b4   :  { %v1714_v25 = vadd.f32 %v1710_v63, %v1702_v47  ;;  %v1889_v43 = vsel %vm1888_vm7, %v1887_v51, 0.0  ;;  %v1910_v62 = vsub.f32 1.0, %v1909_v48 }
 0x5b5   :  { %v1902_v32 = vmul.f32 %v2091_v19, %v1901_v46  ;;  %v1930_v8 = vand.u32 127, %v1929_v61 }
 0x5b6   :  { %v1718_v41 = vsub.f32 0.0, %v1714_v25  ;;  %v1911_v1 = vmul.f32 %v2093_v22, %v1910_v62 }
 0x5b7   :  { %v1903_v36 = vadd.f32 %v2091_v19, %v1902_v32  ;;  %vm1934_vm9 = vcmp.eq.s32.totalorder %v1930_v8, 1  ;;  %vm1931_vm10 = vcmp.eq.s32.totalorder %v1930_v8, 0  ;;  %vm1938_vm11 = vcmp.eq.s32.totalorder %v1930_v8, 2 }
 0x5b8   :  { %v1725_v16 = vsel %vm1719_vm15, %v1718_v41, 0.0  ;;  %vm1904_vm15 = vweird.f32 %v2091_v19  ;;  %v1912_v60 = vadd.f32 %v2093_v22, %v1911_v1  ;;  %vm1942_vm12 = vcmp.eq.s32.totalorder %v1930_v8, 3 }
 0x5b9   :  { %v1726_v42 = vadd.f32 %v1725_v16, %v1724_v35  ;;  %v1905_v5 = vsel %vm1904_vm15, %v2091_v19, %v1903_v36 }
 0x5ba   :  { %v1914_v52 = vsel %vm1913_vm8, %v2093_v22, %v1912_v60 }
 0x5bb   :  { %1727 = vadd.xlane.f32.xlu0 %v1726_v42 }
 0x5c3   :  { %1890 = vadd.xlane.f32.xlu0 %v1889_v43 }
 0x62e   :  { %v1728_v45 = vpop.xlane.xlu0 %1727 }
 0x62f   :  { %v1729_v39 = vrot.slane %v1728_v45, 4 }
 0x631   :  { %v1730_v23 = vadd.f32 %v1729_v39, %v1728_v45 }
 0x633   :  { %v1731_v58 = vrot.slane %v1730_v23, 2 }
 0x635   :  { %v1732_v30 = vadd.f32 %v1731_v58, %v1730_v23 }
 0x636   :  { %v1891_v18 = vpop.xlane.xlu0 %1890 }
 0x637   :  { %v1892_v0 = vrot.slane %v1891_v18, 4  ;;  %v1733_v29 = vrot.slane %v1732_v30, 1 }
 0x639   :  { %v1893_v38 = vadd.f32 %v1892_v0, %v1891_v18  ;;  %v1734_v59 = vadd.f32 %v1733_v29, %v1732_v30 }
 0x63b   :  { %v1894_v9 = vrot.slane %v1893_v38, 2  ;;  %1999 = vpush %v1734_v59 }
 0x63c   :  { %2001 = vpush %v1824_v4 }
 0x63d   :  { %v1895_v56 = vadd.f32 %v1894_v9, %v1893_v38  ;;  %2003 = vpush %v1872_v3 }
 0x63f   :  { %v1896_v10 = vrot.slane %v1895_v56, 1 }
 0x641   :  { %v1897_v2 = vadd.f32 %v1896_v10, %v1895_v56 }
 0x643   :  { %2005 = vpush %v1897_v2 }
 0x644   :  { %2007 = vpush %v1905_v5 }
 0x645   :  { %2009 = vpush %v1914_v52 }
 0x66c   :  { %s2000_s4 = spop %1999 }
 0x66d   :  { %s2002_s7 = spop %2001 }
 0x66e   :  { %s2004_s18 = spop %2003 }
 0x66f   :  { %s1874_s19 = sadd.f32 %s2004_s18, %s2002_s7 }
 0x674   :  { %s2006_s20 = spop %2005 }
 0x675   :  { %s2008_s21 = spop %2007 }
 0x676   :  { %s1907_s22 = smul.f32 %s2008_s21, %s1874_s19  ;;  %s2010_s2 = spop %2009 }
 0x677   :  { %s1916_s23 = smul.f32 %s2010_s2, %s2000_s4 }
 0x678   :  { %s1926_s24 = smul.f32 5.0, %s1907_s22  ;;  %v1935_v13 = vstv %s1907_s22 }
 0x679   :  { %s1925_s25 = smul.f32 %s2010_s2, %s2006_s20  ;;  %v1939_v47 = vstv %s1916_s23  ;;  %v1936_v63 = vsel %vm1934_vm9, %v1935_v13, 0.0 }
 0x67a   :  { %s1927_s26 = sadd.f32 %s1926_s24, %s1916_s23  ;;  %v1940_v26 = vsel %vm1938_vm11, %v1939_v47, 0.0 }
 0x67b   :  { %v1943_v25 = vstv %s1925_s25 }
 0x67c   :  { %s1928_s27 = sadd.f32 %s1927_s26, %s1925_s25  ;;  %v1944_v15 = vsel %vm1942_vm12, %v1943_v25, 0.0 }
 0x67e   :  { %v1932_v57 = vstv %s1928_s27 }
 0x67f   :  { %v1933_v21 = vsel %vm1931_vm10, %v1932_v57, 0.0 }
 0x680   :  { %v1937_v6 = vadd.f32 %v1936_v63, %v1933_v21 }
 0x682   :  { %v1941_v20 = vadd.f32 %v1940_v26, %v1937_v6 }
 0x684   :  { %v1945_v28 = vadd.f32 %v1944_v15, %v1941_v20 }
 0x686   :  { %1946 = vst [vmem:[#allocation3] sm:$0x1] %v1945_v28 }
 0x687   :  { %1957 = dma.vmem_to_hbm [thread:$0]  %s1953_s28, 16, %s1955_s9, [#allocation4]  }
 0x688   :  { %2122 = dma.done.wait [#allocation4], 16  }
 0x689   :  { %2123 = vsyncadd [#allocation4], 4294967280 }
 0x68a   :  { %1962 = vsyncpa [#allocation4], 1 }

</bundles_post_ra>
